<compile_context>
chip_gen: v7x
topology: tpu7x:2x2x1
jax: 0.10.0
libtpu: 0.0.40
codegen_flags: <defaults>
</compile_context>

<pallas_src>
import numpy as np
import jax
import jax.numpy as jnp
from jax.experimental import pallas as pl
from jax.experimental.pallas import tpu as pltpu


def _aux_head_kernel(x_ref, p_ref, w1_ref, sc1_ref, sh1_ref,
                     w2_ref, sc2_ref, sh2_ref, wc_ref, bc_ref, o_ref):
    # x_ref : [Bblk, C, 64]      (NCHW with spatial flattened into lanes)
    # p_ref : [4, 64]            pooling weights (1/25 inside each 5x5 window)
    # w1_ref: [C, 128]           1x1 conv weight (transposed)
    # sc1/sh1: [1, 512]          BN1 scale/shift, tiled to (s, k) lane order
    # w2_ref: [512, 768]         2x2 conv weight, rows ordered (s, k)
    # sc2/sh2: [1, 768]          BN2 scale/shift
    # wc_ref: [768, NC], bc_ref: [1, NC]
    # o_ref : [Bblk, NC]
    f32 = jnp.float32

    # stage 0: ReLU on the whole batch tile
    xr = jnp.maximum(x_ref[...].astype(f32), 0.0)            # [Bblk, C, 64]
    pmat = p_ref[...].astype(f32)                             # [4, 64]

    # stage 1: avg-pool (4 fixed windows) + 1x1 conv (C -> 128).
    # Each window: VPU multiply + lane reduce -> [Bblk, C], then one MXU
    # matmul with M = Bblk rows. Results are concatenated lane-wise in
    # (s, k) order so stage 2 is a single plain 2-D matmul (no transposes).
    qs = []
    for s in range(4):
        w = pmat[s:s + 1, :].reshape(1, 1, -1)                # [1, 1, 64]
        p_s = jnp.sum(xr * w, axis=-1)                        # [Bblk, C]
        qs.append(jnp.dot(p_s, w1_ref[...],
                          preferred_element_type=f32))        # [Bblk, 128]
    q = jnp.concatenate(qs, axis=-1)                          # [Bblk, 512]
    q = jnp.maximum(q * sc1_ref[...] + sh1_ref[...], 0.0)     # BN1 + ReLU

    # stage 2: 2x2 conv (128 -> 768) == [Bblk, 512] @ [512, 768], + BN2 + ReLU
    r = jnp.dot(q, w2_ref[...], preferred_element_type=f32)   # [Bblk, 768]
    r = jnp.maximum(r * sc2_ref[...] + sh2_ref[...], 0.0)

    # stage 3: classifier Linear(768 -> NC)
    logits = jnp.dot(r, wc_ref[...], preferred_element_type=f32) + bc_ref[...]
    o_ref[...] = logits.astype(o_ref.dtype)


def _pick_bblk(B: int) -> int:
    # Whole batch in one step when small; otherwise a multiple-of-8 tile so the
    # (Bblk, NC) output block keeps a legal sublane size and several grid steps
    # remain for megacore sharding on v7x.
    if B <= 8:
        return B
    for cand in (64, 32, 16, 8):
        if B % cand == 0:
            return cand
    return B


def aux_head_cifar(x, w1, g1, b1, m1, v1, w2, g2, b2, m2, v2, wc, bc, eps=1e-5):
    """Fused AuxiliaryHeadCIFAR forward.

    x  : [B, C, 8, 8]
    w1 : [128, C]            Conv2d(C, 128, 1, bias=False) weight (squeezed)
    g1,b1,m1,v1 : [128]      BatchNorm2d(128) gamma / beta / running mean / var
    w2 : [768, 128, 2, 2]    Conv2d(128, 768, 2, bias=False) weight
    g2,b2,m2,v2 : [768]      BatchNorm2d(768) params
    wc : [NC, 768], bc : [NC]  classifier Linear
    returns logits [B, NC]
    """
    B, C, H, W = x.shape
    assert H == 8 and W == 8, "AuxiliaryHeadCIFAR assumes an 8x8 input"
    NC = wc.shape[0]
    K1 = w1.shape[0]                 # 128
    K2 = w2.shape[0]                 # 768
    S = 4                            # pooled spatial positions (2x2)

    # ---- one-time host-side parameter folding (zero per-step cost) --------
    # Pooling weights: P[s, t] = 1/25 iff flat pixel t is inside window s.
    # Window starts are rows/cols {0, 3} (5x5 kernel, stride 3, no padding;
    # count_include_pad is irrelevant since no window touches padding).
    P = np.zeros((S, H * W), np.float32)
    for sh, rs in enumerate((0, 3)):
        for sw, cs in enumerate((0, 3)):
            s = sh * 2 + sw
            for r in range(rs, rs + 5):
                for c in range(cs, cs + 5):
                    P[s, r * W + c] = 1.0 / 25.0
    P = jnp.asarray(P)

    w1t = jnp.transpose(w1, (1, 0))                               # [C, 128]
    sc1 = g1 / jnp.sqrt(v1 + eps)
    sh1 = b1 - m1 * sc1
    sc1_t = jnp.tile(sc1, S).reshape(1, S * K1)                   # [1, 512]
    sh1_t = jnp.tile(sh1, S).reshape(1, S * K1)

    # 2x2 conv weight reordered so rows are (s, k): matches the (s, k) lane
    # order produced by concatenating the per-window conv1 outputs.
    w2r = jnp.transpose(w2.reshape(K2, K1, S), (2, 1, 0)).reshape(S * K1, K2)
    sc2 = (g2 / jnp.sqrt(v2 + eps)).reshape(1, K2)
    sh2 = (b2 - m2 * (g2 / jnp.sqrt(v2 + eps))).reshape(1, K2)

    wct = jnp.transpose(wc, (1, 0))                               # [768, NC]
    bc2 = bc.reshape(1, NC)

    x3 = x.reshape(B, C, H * W)                                   # [B, C, 64]

    # ---- batch tiling ------------------------------------------------------
    bblk = _pick_bblk(B)
    assert B % bblk == 0
    grid = (B // bblk,)

    out = pl.pallas_call(
        _aux_head_kernel,
        out_shape=jax.ShapeDtypeStruct((B, NC), x.dtype),
        grid_spec=pltpu.PrefetchScalarGridSpec(
            num_scalar_prefetch=0,
            grid=grid,
            in_specs=[
                pl.BlockSpec((bblk, C, H * W), lambda i: (i, 0, 0)),   # x tile
                pl.BlockSpec((S, H * W), lambda i: (0, 0)),            # pool P
                pl.BlockSpec((C, K1), lambda i: (0, 0)),               # conv1
                pl.BlockSpec((1, S * K1), lambda i: (0, 0)),           # BN1 scale
                pl.BlockSpec((1, S * K1), lambda i: (0, 0)),           # BN1 shift
                pl.BlockSpec((S * K1, K2), lambda i: (0, 0)),          # conv2
                pl.BlockSpec((1, K2), lambda i: (0, 0)),               # BN2 scale
                pl.BlockSpec((1, K2), lambda i: (0, 0)),               # BN2 shift
                pl.BlockSpec((K2, NC), lambda i: (0, 0)),              # classifier W
                pl.BlockSpec((1, NC), lambda i: (0, 0)),               # classifier b
            ],
            out_specs=pl.BlockSpec((bblk, NC), lambda i: (i, 0)),
        ),
        compiler_params=pltpu.CompilerParams(
            dimension_semantics=("parallel",)),
    )(x3, P, w1t, sc1_t, sh1_t, w2r, sc2, sh2, wct, bc2)

    return out


def aux_head_cifar_ref(x, w1, g1, b1, m1, v1, w2, g2, b2, m2, v2, wc, bc,
                       eps=1e-5):
    """Plain-JAX reference (mirrors the PyTorch module, BN in eval mode)."""
    hi = jax.lax.Precision.HIGHEST
    h = jnp.maximum(x, 0.0)
    # AvgPool2d(5, stride=3) on 8x8 -> 2x2
    rows = []
    for rs in (0, 3):
        cols = []
        for cs in (0, 3):
            cols.append(jnp.mean(h[:, :, rs:rs + 5, cs:cs + 5], axis=(2, 3)))
        rows.append(jnp.stack(cols, axis=-1))
    p = jnp.stack(rows, axis=-2)                                   # [B, C, 2, 2]
    # Conv2d(C, 128, 1) + BN + ReLU
    q = jnp.einsum('bchw,kc->bkhw', p, w1, precision=hi)
    q = (q - m1[None, :, None, None]) / jnp.sqrt(v1[None, :, None, None] + eps)
    q = q * g1[None, :, None, None] + b1[None, :, None, None]
    q = jnp.maximum(q, 0.0)
    # Conv2d(128, 768, 2) on 2x2 (valid) + BN + ReLU
    r = jnp.einsum('bkhw,okhw->bo', q, w2, precision=hi)
    r = (r - m2) / jnp.sqrt(v2 + eps) * g2 + b2
    r = jnp.maximum(r, 0.0)
    # Linear(768, NC)
    return jnp.dot(r, wc.T, precision=hi) + bc


if __name__ == "__main__":
    B, C, NC = 2, 4, 10
    key = jax.random.PRNGKey(0)
    ks = jax.random.split(key, 13)

    x = jax.random.normal(ks[0], (B, C, 8, 8), jnp.float32)
    w1 = jax.random.normal(ks[1], (128, C), jnp.float32) * 0.2
    g1 = jax.random.uniform(ks[2], (128,), jnp.float32, 0.5, 1.5)
    b1 = jax.random.normal(ks[3], (128,), jnp.float32) * 0.1
    m1 = jax.random.normal(ks[4], (128,), jnp.float32) * 0.1
    v1 = jax.random.uniform(ks[5], (128,), jnp.float32, 0.5, 1.5)
    w2 = jax.random.normal(ks[6], (768, 128, 2, 2), jnp.float32) * 0.05
    g2 = jax.random.uniform(ks[7], (768,), jnp.float32, 0.5, 1.5)
    b2 = jax.random.normal(ks[8], (768,), jnp.float32) * 0.1
    m2 = jax.random.normal(ks[9], (768,), jnp.float32) * 0.1
    v2 = jax.random.uniform(ks[10], (768,), jnp.float32, 0.5, 1.5)
    wc = jax.random.normal(ks[11], (NC, 768), jnp.float32) * 0.05
    bc = jax.random.normal(ks[12], (NC,), jnp.float32) * 0.1

    out = aux_head_cifar(x, w1, g1, b1, m1, v1, w2, g2, b2, m2, v2, wc, bc)
    out = jax.block_until_ready(out)
    ref = aux_head_cifar_ref(x, w1, g1, b1, m1, v1, w2, g2, b2, m2, v2, wc, bc)

    assert out.shape == (B, NC)
    max_diff = float(jnp.max(jnp.abs(out - ref)))
    assert jnp.allclose(out, ref, atol=2e-3, rtol=2e-3), (
        f"mismatch vs reference: max|diff|={max_diff}")
    print("KERNEL_OK")
</pallas_src>

<mosaic_0001>
module attributes {stable_mosaic.version = 11 : i64} {
  func.func @_aux_head_kernel(%arg0: i32, %arg1: memref<2x4x64xf32, #tpu.memory_space<vmem>>, %arg2: memref<4x64xf32, #tpu.memory_space<vmem>>, %arg3: memref<4x128xf32, #tpu.memory_space<vmem>>, %arg4: memref<1x512xf32, #tpu.memory_space<vmem>>, %arg5: memref<1x512xf32, #tpu.memory_space<vmem>>, %arg6: memref<512x768xf32, #tpu.memory_space<vmem>>, %arg7: memref<1x768xf32, #tpu.memory_space<vmem>>, %arg8: memref<1x768xf32, #tpu.memory_space<vmem>>, %arg9: memref<768x10xf32, #tpu.memory_space<vmem>>, %arg10: memref<1x10xf32, #tpu.memory_space<vmem>>, %arg11: memref<2x10xf32, #tpu.memory_space<vmem>>) attributes {dimension_semantics = [#tpu.dimension_semantics<parallel>], iteration_bounds = array<i64: 1>, scalar_prefetch = 0 : i64, scratch_operands = 0 : i64, tpu.core_type = #tpu.core_type<tc>, window_params = [{transform_indices = @transform_0, window_bounds = array<i64: 2, 4, 64>}, {pipeline_mode = #tpu.pipeline_mode<synchronous>, transform_indices = @transform_1, window_bounds = array<i64: 4, 64>}, {pipeline_mode = #tpu.pipeline_mode<synchronous>, transform_indices = @transform_2, window_bounds = array<i64: 4, 128>}, {pipeline_mode = #tpu.pipeline_mode<synchronous>, transform_indices = @transform_3, window_bounds = array<i64: 1, 512>}, {pipeline_mode = #tpu.pipeline_mode<synchronous>, transform_indices = @transform_4, window_bounds = array<i64: 1, 512>}, {pipeline_mode = #tpu.pipeline_mode<synchronous>, transform_indices = @transform_5, window_bounds = array<i64: 512, 768>}, {pipeline_mode = #tpu.pipeline_mode<synchronous>, transform_indices = @transform_6, window_bounds = array<i64: 1, 768>}, {pipeline_mode = #tpu.pipeline_mode<synchronous>, transform_indices = @transform_7, window_bounds = array<i64: 1, 768>}, {pipeline_mode = #tpu.pipeline_mode<synchronous>, transform_indices = @transform_8, window_bounds = array<i64: 768, 10>}, {pipeline_mode = #tpu.pipeline_mode<synchronous>, transform_indices = @transform_9, window_bounds = array<i64: 1, 10>}, {transform_indices = @transform_10, window_bounds = array<i64: 2, 10>}]} {
    %c0 = arith.constant 0 : index
    %c0_0 = arith.constant 0 : index
    %c0_1 = arith.constant 0 : index
    %0 = vector.load %arg1[%c0, %c0_0, %c0_1] : memref<2x4x64xf32, #tpu.memory_space<vmem>>, vector<2x4x64xf32>
    %cst = arith.constant 0.000000e+00 : f32
    %1 = vector.broadcast %cst : f32 to vector<2x4x64xf32>
    %2 = arith.maximumf %0, %1 : vector<2x4x64xf32>
    %c0_2 = arith.constant 0 : index
    %c0_3 = arith.constant 0 : index
    %3 = vector.load %arg2[%c0_2, %c0_3] : memref<4x64xf32, #tpu.memory_space<vmem>>, vector<4x64xf32>
    %4 = vector.extract_strided_slice %3 {offsets = [0, 0], sizes = [1, 64], strides = [1, 1]} : vector<4x64xf32> to vector<1x64xf32>
    %5 = vector.shape_cast %4 : vector<1x64xf32> to vector<1x1x64xf32>
    %6 = vector.broadcast %5 : vector<1x1x64xf32> to vector<2x4x64xf32>
    %7 = arith.mulf %2, %6 : vector<2x4x64xf32>
    %cst_4 = arith.constant dense<0.000000e+00> : vector<2x4xf32>
    %8 = vector.multi_reduction <add>, %7, %cst_4 [2] : vector<2x4x64xf32> to vector<2x4xf32>
    %c0_5 = arith.constant 0 : index
    %c0_6 = arith.constant 0 : index
    %9 = vector.load %arg3[%c0_5, %c0_6] : memref<4x128xf32, #tpu.memory_space<vmem>>, vector<4x128xf32>
    %cst_7 = arith.constant dense<0.000000e+00> : vector<2x128xf32>
    %10 = tpu.matmul %8, %9, %cst_7 {dimension_numbers = #tpu.dot_dimension_numbers<[1], [0], [0], [1], [0, 0, 1, 1], [], []>} : vector<2x4xf32>, vector<4x128xf32>, vector<2x128xf32> -> vector<2x128xf32>
    %11 = vector.extract_strided_slice %3 {offsets = [1, 0], sizes = [1, 64], strides = [1, 1]} : vector<4x64xf32> to vector<1x64xf32>
    %12 = vector.shape_cast %11 : vector<1x64xf32> to vector<1x1x64xf32>
    %13 = vector.broadcast %12 : vector<1x1x64xf32> to vector<2x4x64xf32>
    %14 = arith.mulf %2, %13 : vector<2x4x64xf32>
    %cst_8 = arith.constant dense<0.000000e+00> : vector<2x4xf32>
    %15 = vector.multi_reduction <add>, %14, %cst_8 [2] : vector<2x4x64xf32> to vector<2x4xf32>
    %c0_9 = arith.constant 0 : index
    %c0_10 = arith.constant 0 : index
    %16 = vector.load %arg3[%c0_9, %c0_10] : memref<4x128xf32, #tpu.memory_space<vmem>>, vector<4x128xf32>
    %cst_11 = arith.constant dense<0.000000e+00> : vector<2x128xf32>
    %17 = tpu.matmul %15, %16, %cst_11 {dimension_numbers = #tpu.dot_dimension_numbers<[1], [0], [0], [1], [0, 0, 1, 1], [], []>} : vector<2x4xf32>, vector<4x128xf32>, vector<2x128xf32> -> vector<2x128xf32>
    %18 = vector.extract_strided_slice %3 {offsets = [2, 0], sizes = [1, 64], strides = [1, 1]} : vector<4x64xf32> to vector<1x64xf32>
    %19 = vector.shape_cast %18 : vector<1x64xf32> to vector<1x1x64xf32>
    %20 = vector.broadcast %19 : vector<1x1x64xf32> to vector<2x4x64xf32>
    %21 = arith.mulf %2, %20 : vector<2x4x64xf32>
    %cst_12 = arith.constant dense<0.000000e+00> : vector<2x4xf32>
    %22 = vector.multi_reduction <add>, %21, %cst_12 [2] : vector<2x4x64xf32> to vector<2x4xf32>
    %c0_13 = arith.constant 0 : index
    %c0_14 = arith.constant 0 : index
    %23 = vector.load %arg3[%c0_13, %c0_14] : memref<4x128xf32, #tpu.memory_space<vmem>>, vector<4x128xf32>
    %cst_15 = arith.constant dense<0.000000e+00> : vector<2x128xf32>
    %24 = tpu.matmul %22, %23, %cst_15 {dimension_numbers = #tpu.dot_dimension_numbers<[1], [0], [0], [1], [0, 0, 1, 1], [], []>} : vector<2x4xf32>, vector<4x128xf32>, vector<2x128xf32> -> vector<2x128xf32>
    %25 = vector.extract_strided_slice %3 {offsets = [3, 0], sizes = [1, 64], strides = [1, 1]} : vector<4x64xf32> to vector<1x64xf32>
    %26 = vector.shape_cast %25 : vector<1x64xf32> to vector<1x1x64xf32>
    %27 = vector.broadcast %26 : vector<1x1x64xf32> to vector<2x4x64xf32>
    %28 = arith.mulf %2, %27 : vector<2x4x64xf32>
    %cst_16 = arith.constant dense<0.000000e+00> : vector<2x4xf32>
    %29 = vector.multi_reduction <add>, %28, %cst_16 [2] : vector<2x4x64xf32> to vector<2x4xf32>
    %c0_17 = arith.constant 0 : index
    %c0_18 = arith.constant 0 : index
    %30 = vector.load %arg3[%c0_17, %c0_18] : memref<4x128xf32, #tpu.memory_space<vmem>>, vector<4x128xf32>
    %cst_19 = arith.constant dense<0.000000e+00> : vector<2x128xf32>
    %31 = tpu.matmul %29, %30, %cst_19 {dimension_numbers = #tpu.dot_dimension_numbers<[1], [0], [0], [1], [0, 0, 1, 1], [], []>} : vector<2x4xf32>, vector<4x128xf32>, vector<2x128xf32> -> vector<2x128xf32>
    %32 = tpu.concatenate %10, %17, %24, %31 in 1 : vector<2x128xf32>, vector<2x128xf32>, vector<2x128xf32>, vector<2x128xf32> -> vector<2x512xf32>
    %c0_20 = arith.constant 0 : index
    %c0_21 = arith.constant 0 : index
    %33 = vector.load %arg4[%c0_20, %c0_21] : memref<1x512xf32, #tpu.memory_space<vmem>>, vector<1x512xf32>
    %34 = vector.broadcast %33 : vector<1x512xf32> to vector<2x512xf32>
    %35 = arith.mulf %32, %34 : vector<2x512xf32>
    %c0_22 = arith.constant 0 : index
    %c0_23 = arith.constant 0 : index
    %36 = vector.load %arg5[%c0_22, %c0_23] : memref<1x512xf32, #tpu.memory_space<vmem>>, vector<1x512xf32>
    %37 = vector.broadcast %36 : vector<1x512xf32> to vector<2x512xf32>
    %38 = arith.addf %35, %37 : vector<2x512xf32>
    %cst_24 = arith.constant 0.000000e+00 : f32
    %39 = vector.broadcast %cst_24 : f32 to vector<2x512xf32>
    %40 = arith.maximumf %38, %39 : vector<2x512xf32>
    %c0_25 = arith.constant 0 : index
    %c0_26 = arith.constant 0 : index
    %41 = vector.load %arg6[%c0_25, %c0_26] : memref<512x768xf32, #tpu.memory_space<vmem>>, vector<512x768xf32>
    %cst_27 = arith.constant dense<0.000000e+00> : vector<2x768xf32>
    %42 = tpu.matmul %40, %41, %cst_27 {dimension_numbers = #tpu.dot_dimension_numbers<[1], [0], [0], [1], [0, 0, 1, 1], [], []>} : vector<2x512xf32>, vector<512x768xf32>, vector<2x768xf32> -> vector<2x768xf32>
    %c0_28 = arith.constant 0 : index
    %c0_29 = arith.constant 0 : index
    %43 = vector.load %arg7[%c0_28, %c0_29] : memref<1x768xf32, #tpu.memory_space<vmem>>, vector<1x768xf32>
    %44 = vector.broadcast %43 : vector<1x768xf32> to vector<2x768xf32>
    %45 = arith.mulf %42, %44 : vector<2x768xf32>
    %c0_30 = arith.constant 0 : index
    %c0_31 = arith.constant 0 : index
    %46 = vector.load %arg8[%c0_30, %c0_31] : memref<1x768xf32, #tpu.memory_space<vmem>>, vector<1x768xf32>
    %47 = vector.broadcast %46 : vector<1x768xf32> to vector<2x768xf32>
    %48 = arith.addf %45, %47 : vector<2x768xf32>
    %cst_32 = arith.constant 0.000000e+00 : f32
    %49 = vector.broadcast %cst_32 : f32 to vector<2x768xf32>
    %50 = arith.maximumf %48, %49 : vector<2x768xf32>
    %c0_33 = arith.constant 0 : index
    %c0_34 = arith.constant 0 : index
    %51 = vector.load %arg9[%c0_33, %c0_34] : memref<768x10xf32, #tpu.memory_space<vmem>>, vector<768x10xf32>
    %cst_35 = arith.constant dense<0.000000e+00> : vector<2x10xf32>
    %52 = tpu.matmul %50, %51, %cst_35 {dimension_numbers = #tpu.dot_dimension_numbers<[1], [0], [0], [1], [0, 0, 1, 1], [], []>} : vector<2x768xf32>, vector<768x10xf32>, vector<2x10xf32> -> vector<2x10xf32>
    %c0_36 = arith.constant 0 : index
    %c0_37 = arith.constant 0 : index
    %53 = vector.load %arg10[%c0_36, %c0_37] : memref<1x10xf32, #tpu.memory_space<vmem>>, vector<1x10xf32>
    %54 = vector.broadcast %53 : vector<1x10xf32> to vector<2x10xf32>
    %55 = arith.addf %52, %54 : vector<2x10xf32>
    %c0_38 = arith.constant 0 : index
    %c0_39 = arith.constant 0 : index
    %56 = vector.load %arg11[%c0_38, %c0_39] : memref<2x10xf32, #tpu.memory_space<vmem>>, vector<2x10xf32>
    tpu.vector_store %arg11[%c0_38, %c0_39], %55 {strides = array<i32>} : memref<2x10xf32, #tpu.memory_space<vmem>>, vector<2x10xf32>,
    return
  }
  func.func @transform_0(%arg0: i32) -> (i32, i32, i32) {
    %c0_i32 = arith.constant 0 : i32
    %c0_i32_0 = arith.constant 0 : i32
    %c0_i32_1 = arith.constant 0 : i32
    return %arg0, %c0_i32, %c0_i32_0 : i32, i32, i32
  }
  func.func @transform_1(%arg0: i32) -> (i32, i32) {
    %c0_i32 = arith.constant 0 : i32
    %c0_i32_0 = arith.constant 0 : i32
    %c0_i32_1 = arith.constant 0 : i32
    return %c0_i32, %c0_i32_0 : i32, i32
  }
  func.func @transform_2(%arg0: i32) -> (i32, i32) {
    %c0_i32 = arith.constant 0 : i32
    %c0_i32_0 = arith.constant 0 : i32
    %c0_i32_1 = arith.constant 0 : i32
    return %c0_i32, %c0_i32_0 : i32, i32
  }
  func.func @transform_3(%arg0: i32) -> (i32, i32) {
    %c0_i32 = arith.constant 0 : i32
    %c0_i32_0 = arith.constant 0 : i32
    %c0_i32_1 = arith.constant 0 : i32
    return %c0_i32, %c0_i32_0 : i32, i32
  }
  func.func @transform_4(%arg0: i32) -> (i32, i32) {
    %c0_i32 = arith.constant 0 : i32
    %c0_i32_0 = arith.constant 0 : i32
    %c0_i32_1 = arith.constant 0 : i32
    return %c0_i32, %c0_i32_0 : i32, i32
  }
  func.func @transform_5(%arg0: i32) -> (i32, i32) {
    %c0_i32 = arith.constant 0 : i32
    %c0_i32_0 = arith.constant 0 : i32
    %c0_i32_1 = arith.constant 0 : i32
    return %c0_i32, %c0_i32_0 : i32, i32
  }
  func.func @transform_6(%arg0: i32) -> (i32, i32) {
    %c0_i32 = arith.constant 0 : i32
    %c0_i32_0 = arith.constant 0 : i32
    %c0_i32_1 = arith.constant 0 : i32
    return %c0_i32, %c0_i32_0 : i32, i32
  }
  func.func @transform_7(%arg0: i32) -> (i32, i32) {
    %c0_i32 = arith.constant 0 : i32
    %c0_i32_0 = arith.constant 0 : i32
    %c0_i32_1 = arith.constant 0 : i32
    return %c0_i32, %c0_i32_0 : i32, i32
  }
  func.func @transform_8(%arg0: i32) -> (i32, i32) {
    %c0_i32 = arith.constant 0 : i32
    %c0_i32_0 = arith.constant 0 : i32
    %c0_i32_1 = arith.constant 0 : i32
    return %c0_i32, %c0_i32_0 : i32, i32
  }
  func.func @transform_9(%arg0: i32) -> (i32, i32) {
    %c0_i32 = arith.constant 0 : i32
    %c0_i32_0 = arith.constant 0 : i32
    %c0_i32_1 = arith.constant 0 : i32
    return %c0_i32, %c0_i32_0 : i32, i32
  }
  func.func @transform_10(%arg0: i32) -> (i32, i32) {
    %c0_i32 = arith.constant 0 : i32
    %c0_i32_0 = arith.constant 0 : i32
    return %arg0, %c0_i32 : i32, i32
  }
}

</mosaic_0001>

<bundles_post_ra>
// kernel: tpu_custom_call.1
= control target key start
LH: loop header
LB: loop body
LE: loop exit
PB: predicated region body
PF: predicated region fallthrough
CT: control target
= control target key end

     0   :  { %15 = vsyncpa [#allocation3], 0  ;;  %s3301_s0 = inlined_call_operand.hbm [shape: f32[2,4,64], index: 0, kind: input, shape index: {}]   ;;  %s3302_s1 = inlined_call_operand.hbm [shape: f32[4,64], index: 1, kind: input, shape index: {}]   ;;  %s3303_s2 = inlined_call_operand.hbm [shape: f32[4,128], index: 2, kind: input, shape index: {}]   ;;  %s3304_s3 = inlined_call_operand.hbm [shape: f32[1,512], index: 3, kind: input, shape index: {}]   ;;  %s3305_s4 = inlined_call_operand.hbm [shape: f32[1,512], index: 4, kind: input, shape index: {}]   ;;  %s3306_s5 = inlined_call_operand.hbm [shape: f32[512,768], index: 5, kind: input, shape index: {}]   ;;  %s3307_s6 = inlined_call_operand.hbm [shape: f32[1,768], index: 6, kind: input, shape index: {}]   ;;  %s3308_s7 = inlined_call_operand.hbm [shape: f32[1,768], index: 7, kind: input, shape index: {}]   ;;  %s3309_s8 = inlined_call_operand.vmem [shape: f32[768,10], index: 8, kind: input, shape index: {}]   ;;  %s3310_s9 = inlined_call_operand.hbm [shape: f32[1,10], index: 9, kind: input, shape index: {}]   ;;  %s3311_s10 = inlined_call_operand.hbm [shape: f32[2,10], index: 10, kind: output, shape index: {}]  }
   0x1   :  { %16 = vsyncpa [#allocation6], 0 }
   0x2   :  { %17 = vsyncpa [#allocation9], 0 }
   0x3   :  { %18 = vsyncpa [#allocation12], 0 }
   0x4   :  { %19 = vsyncpa [#allocation15], 0 }
   0x5   :  { %20 = vsyncpa [#allocation4], 0  ;;  %s2697_s13 = smov [#allocation5]   ;;  %s2698_s15 = smov [#allocation8]  }
   0x6   :  { %s39_s14 = sshll.u32 %s2697_s13, 4  ;;  %s59_s16 = sshll.u32 %s2698_s15, 4  ;;  %s40_s14 = int_to_ptr.vmem [resolvable:$true] %s39_s14  ;;  %s60_s16 = int_to_ptr.vmem [resolvable:$true] %s59_s16 }
   0x7   :  { %s2465_s19 = scalar_lea.hbm %s3302_s1, 64 }
   0x8   :  { %p2466_p0 = scmp.ne.s32.totalorder %s3302_s1, %s2465_s19  ;;  %p2469_p1 = scmp.lt.u32.totalorder %s2465_s19, %s3302_s1 }
   0xa   :  { %p2471_p2 = pnand %p2469_p1, %p2466_p0 }
   0xc   :  { %2474 = shalt.err (!%p2471_p2)
}
   0xd   :  { %s2475_s24 = scalar_lea.vmem %s40_s14, 64  ;;  %p2480_p4 = scmp.lt.s32.totalorder %s40_s14, %s40_s14 }
   0xe   :  { %p2476_p3 = scmp.ne.s32.totalorder %s40_s14, %s2475_s24  ;;  %p2481_p5 = scmp.lt.s32.totalorder %s2475_s24, %s2475_s24 }
  0x10   :  { %p2482_p6 = por %p2481_p5, %p2480_p4 }
  0x12   :  { %p2483_p7 = pnand %p2482_p6, %p2476_p3 }
  0x14   :  { %2486 = shalt.err (!%p2483_p7)
}
  0x15   :  { %42 = dma.hbm_to_vmem [thread:$0]  %s3302_s1, 64, %s40_s14, [#allocation6]  }
  0x16   :  { %s2487_s29 = scalar_lea.hbm %s3304_s3, 64 }
  0x17   :  { %p2488_p8 = scmp.ne.s32.totalorder %s3304_s3, %s2487_s29  ;;  %p2491_p9 = scmp.lt.u32.totalorder %s2487_s29, %s3304_s3 }
  0x19   :  { %p2493_p10 = pnand %p2491_p9, %p2488_p8 }
  0x1b   :  { %2496 = shalt.err (!%p2493_p10)
}
  0x1c   :  { %s2497_s15 = scalar_lea.vmem %s60_s16, 64  ;;  %p2502_p12 = scmp.lt.s32.totalorder %s60_s16, %s60_s16 }
  0x1d   :  { %p2498_p11 = scmp.ne.s32.totalorder %s60_s16, %s2497_s15  ;;  %p2503_p13 = scmp.lt.s32.totalorder %s2497_s15, %s2497_s15 }
  0x1f   :  { %p2504_p0 = por %p2503_p13, %p2502_p12 }
  0x21   :  { %p2505_p1 = pnand %p2504_p0, %p2498_p11 }
  0x23   :  { %2508 = shalt.err (!%p2505_p1)
}
  0x24   :  { %62 = dma.hbm_to_vmem [thread:$0]  %s3304_s3, 64, %s60_s16, [#allocation9]  }
  0x25   :  { %s2699_s17 = smov [#allocation11]   ;;  %s2509_s21 = scalar_lea.hbm %s3306_s5, 49152 }
  0x26   :  { %s78_s18 = sshll.u32 %s2699_s17, 4  ;;  %p2510_p2 = scmp.ne.s32.totalorder %s3306_s5, %s2509_s21  ;;  %s79_s18 = int_to_ptr.vmem [resolvable:$true] %s78_s18 }
  0x27   :  { %p2513_p3 = scmp.lt.u32.totalorder %s2509_s21, %s3306_s5 }
  0x29   :  { %p2515_p4 = pnand %p2513_p3, %p2510_p2 }
  0x2b   :  { %2518 = shalt.err (!%p2515_p4)
}
  0x2c   :  { %s2519_s26 = scalar_lea.vmem %s79_s18, 49152  ;;  %p2524_p6 = scmp.lt.s32.totalorder %s79_s18, %s79_s18 }
  0x2d   :  { %p2520_p5 = scmp.ne.s32.totalorder %s79_s18, %s2519_s26  ;;  %p2525_p7 = scmp.lt.s32.totalorder %s2519_s26, %s2519_s26 }
  0x2f   :  { %p2526_p8 = por %p2525_p7, %p2524_p6 }
  0x31   :  { %p2527_p9 = pnand %p2526_p8, %p2520_p5 }
  0x33   :  { %2530 = shalt.err (!%p2527_p9)
}
  0x34   :  { %s2700_s3 = smov 768   ;;  %s2701_s16 = smov 48  }
  0x35   :  { %84 = dma.hbm_to_vmem [thread:$0]  %s3306_s5, 49152, %s79_s18, [#allocation12], %s2700_s3, %s2700_s3, %s2701_s16  }
  0x36   :  { %s2702_s29 = smov [#allocation14]   ;;  %s2703_s11 = smov [#allocation2]  }
  0x37   :  { %s101_s30 = sshll.u32 %s2702_s29, 4  ;;  %s26_s12 = sshll.u32 %s2703_s11, 4  ;;  %s102_s30 = int_to_ptr.vmem [resolvable:$true] %s101_s30  ;;  %s27_s12 = int_to_ptr.vmem [resolvable:$true] %s26_s12 }
  0x38   :  { %s2531_s1 = scalar_lea.hbm %s3308_s7, 96 }
  0x39   :  { %p2532_p10 = scmp.ne.s32.totalorder %s3308_s7, %s2531_s1  ;;  %p2535_p11 = scmp.lt.u32.totalorder %s2531_s1, %s3308_s7 }
  0x3b   :  { %p2537_p12 = pnand %p2535_p11, %p2532_p10 }
  0x3d   :  { %2540 = shalt.err (!%p2537_p12)
}
  0x3e   :  { %s2541_s5 = scalar_lea.vmem %s102_s30, 96  ;;  %p2546_p0 = scmp.lt.s32.totalorder %s102_s30, %s102_s30 }
  0x3f   :  { %p2542_p13 = scmp.ne.s32.totalorder %s102_s30, %s2541_s5  ;;  %p2547_p1 = scmp.lt.s32.totalorder %s2541_s5, %s2541_s5 }
  0x41   :  { %p2548_p2 = por %p2547_p1, %p2546_p0 }
  0x43   :  { %p2549_p3 = pnand %p2548_p2, %p2542_p13 }
  0x45   :  { %2552 = shalt.err (!%p2549_p3)
}
  0x46   :  { %104 = dma.hbm_to_vmem [thread:$0]  %s3308_s7, 96, %s102_s30, [#allocation15]  }
  0x47   :  { %s2553_s24 = scalar_lea.hbm %s3301_s0, 128 }
  0x48   :  { %p2554_p4 = scmp.ne.s32.totalorder %s3301_s0, %s2553_s24  ;;  %p2557_p5 = scmp.lt.u32.totalorder %s2553_s24, %s3301_s0 }
  0x4a   :  { %p2559_p6 = pnand %p2557_p5, %p2554_p4 }
  0x4c   :  { %2562 = shalt.err (!%p2559_p6)
}
  0x4d   :  { %s2563_s27 = scalar_lea.vmem %s27_s12, 128  ;;  %p2568_p8 = scmp.lt.s32.totalorder %s27_s12, %s27_s12 }
  0x4e   :  { %p2564_p7 = scmp.ne.s32.totalorder %s27_s12, %s2563_s27  ;;  %p2569_p9 = scmp.lt.s32.totalorder %s2563_s27, %s2563_s27 }
  0x50   :  { %p2570_p10 = por %p2569_p9, %p2568_p8 }
  0x52   :  { %p2571_p11 = pnand %p2570_p10, %p2564_p7 }
  0x54   :  { %2574 = shalt.err (!%p2571_p11)
}
  0x55   :  { %s2704_s7 = smov 64   ;;  %s2705_s28 = smov 4  }
  0x56   :  { %32 = dma.hbm_to_vmem [thread:$0]  %s3301_s0, 128, %s27_s12, [#allocation3], %s2704_s7, %s2704_s7, %s2705_s28  }
  0x57   :  { %s2706_s11 = smov [#allocation7]   ;;  %s2707_s15 = smov [#allocation10]  }
  0x58   :  { %s49_s13 = sshll.u32 %s2706_s11, 4  ;;  %s69_s1 = sshll.u32 %s2707_s15, 4  ;;  %s50_s13 = int_to_ptr.vmem [resolvable:$true] %s49_s13  ;;  %s70_s1 = int_to_ptr.vmem [resolvable:$true] %s69_s1 }
  0x59   :  { %s2575_s19 = scalar_lea.hbm %s3303_s2, 64 }
  0x5a   :  { %p2576_p12 = scmp.ne.s32.totalorder %s3303_s2, %s2575_s19  ;;  %p2579_p13 = scmp.lt.u32.totalorder %s2575_s19, %s3303_s2 }
  0x5c   :  { %p2581_p0 = pnand %p2579_p13, %p2576_p12 }
  0x5e   :  { %2584 = shalt.err (!%p2581_p0)
}
  0x5f   :  { %s2585_s0 = scalar_lea.vmem %s50_s13, 64  ;;  %p2590_p2 = scmp.lt.s32.totalorder %s50_s13, %s50_s13 }
  0x60   :  { %p2586_p1 = scmp.ne.s32.totalorder %s50_s13, %s2585_s0  ;;  %p2591_p3 = scmp.lt.s32.totalorder %s2585_s0, %s2585_s0 }
  0x62   :  { %p2592_p4 = por %p2591_p3, %p2590_p2 }
  0x64   :  { %p2593_p5 = pnand %p2592_p4, %p2586_p1 }
  0x66   :  { %2596 = shalt.err (!%p2593_p5)
}
  0x67   :  { %52 = dma.hbm_to_vmem [thread:$0]  %s3303_s2, 64, %s50_s13, [#allocation6]  }
  0x68   :  { %s2597_s25 = scalar_lea.hbm %s3305_s4, 64 }
  0x69   :  { %p2598_p6 = scmp.ne.s32.totalorder %s3305_s4, %s2597_s25  ;;  %p2601_p7 = scmp.lt.u32.totalorder %s2597_s25, %s3305_s4 }
  0x6b   :  { %p2603_p8 = pnand %p2601_p7, %p2598_p6 }
  0x6d   :  { %2606 = shalt.err (!%p2603_p8)
}
  0x6e   :  { %s2607_s7 = scalar_lea.vmem %s70_s1, 64  ;;  %p2612_p10 = scmp.lt.s32.totalorder %s70_s1, %s70_s1 }
  0x6f   :  { %p2608_p9 = scmp.ne.s32.totalorder %s70_s1, %s2607_s7  ;;  %p2613_p11 = scmp.lt.s32.totalorder %s2607_s7, %s2607_s7 }
  0x71   :  { %p2614_p12 = por %p2613_p11, %p2612_p10 }
  0x73   :  { %p2615_p13 = pnand %p2614_p12, %p2608_p9 }
  0x75   :  { %2618 = shalt.err (!%p2615_p13)
}
  0x76   :  { %72 = dma.hbm_to_vmem [thread:$0]  %s3305_s4, 64, %s70_s1, [#allocation9]  }
  0x77   :  { %s2708_s29 = smov [#allocation13]   ;;  %s2709_s11 = smov [#allocation16]  }
  0x78   :  { %s91_s30 = sshll.u32 %s2708_s29, 4  ;;  %s113_s13 = sshll.u32 %s2709_s11, 4  ;;  %s92_s30 = int_to_ptr.vmem [resolvable:$true] %s91_s30  ;;  %s114_s13 = int_to_ptr.vmem [resolvable:$true] %s113_s13 }
  0x79   :  { %s2619_s17 = scalar_lea.hbm %s3307_s6, 96 }
  0x7a   :  { %p2620_p0 = scmp.ne.s32.totalorder %s3307_s6, %s2619_s17  ;;  %p2623_p1 = scmp.lt.u32.totalorder %s2619_s17, %s3307_s6 }
  0x7c   :  { %p2625_p2 = pnand %p2623_p1, %p2620_p0 }
  0x7e   :  { %2628 = shalt.err (!%p2625_p2)
}
  0x7f   :  { %s2629_s4 = scalar_lea.vmem %s92_s30, 96  ;;  %p2634_p4 = scmp.lt.s32.totalorder %s92_s30, %s92_s30 }
  0x80   :  { %p2630_p3 = scmp.ne.s32.totalorder %s92_s30, %s2629_s4  ;;  %p2635_p5 = scmp.lt.s32.totalorder %s2629_s4, %s2629_s4 }
  0x82   :  { %p2636_p6 = por %p2635_p5, %p2634_p4 }
  0x84   :  { %p2637_p7 = pnand %p2636_p6, %p2630_p3 }
  0x86   :  { %2640 = shalt.err (!%p2637_p7)
}
  0x87   :  { %94 = dma.hbm_to_vmem [thread:$0]  %s3307_s6, 96, %s92_s30, [#allocation12]  }
  0x88   :  { %s2641_s22 = scalar_lea.hbm %s3310_s9, 16 }
  0x89   :  { %p2642_p8 = scmp.ne.s32.totalorder %s3310_s9, %s2641_s22  ;;  %p2645_p9 = scmp.lt.u32.totalorder %s2641_s22, %s3310_s9 }
  0x8b   :  { %p2647_p10 = pnand %p2645_p9, %p2642_p8 }
  0x8d   :  { %2650 = shalt.err (!%p2647_p10)
}
  0x8e   :  { %s2651_s3 = scalar_lea.vmem %s114_s13, 16  ;;  %s2655_s16 = scalar_lea.vmem %s114_s13, 32 }
  0x8f   :  { %p2652_p11 = scmp.ne.s32.totalorder %s114_s13, %s2651_s3  ;;  %p2656_p12 = scmp.lt.s32.totalorder %s114_s13, %s114_s13 }
  0x90   :  { %p2657_p13 = scmp.lt.s32.totalorder %s2655_s16, %s2651_s3 }
  0x92   :  { %p2658_p0 = por %p2657_p13, %p2656_p12 }
  0x94   :  { %p2659_p1 = pnand %p2658_p0, %p2652_p11 }
  0x96   :  { %2662 = shalt.err (!%p2659_p1)
}
  0x97   :  { %116 = dma.hbm_to_vmem [thread:$0]  %s3310_s9, 16, %s114_s13, [#allocation15]  }
  0x98   :  { %2685 = dma.done.wait [#allocation3], 128  }
  0x99   :  { %2686 = vsyncadd [#allocation3], 4294967168 }
  0x9a   :  { %2687 = dma.done.wait [#allocation6], 128  }
  0x9b   :  { %2688 = vsyncadd [#allocation6], 4294967168 }
  0x9c   :  { %2689 = dma.done.wait [#allocation9], 128  }
  0x9d   :  { %2690 = vsyncadd [#allocation9], 4294967168 }
  0x9e   :  { %2691 = dma.done.wait [#allocation12], 49248  }
  0x9f   :  { %2692 = vsyncadd [#allocation12], 4294918048 }
  0xa0   :  { %2693 = dma.done.wait [#allocation15], 112  }
  0xa1   :  { %2694 = vsyncadd [#allocation15], 4294967184  ;;  %v149_v0 = vlaneseq  ;;  %v144_v5 = vld [vmem:[#allocation2] sm:$0xf]  ;;  %v148_v6 = vld [vmem:[#allocation5] sm:$0xf] }
  0xa2   :  { %v145_v7 = vld [vmem:[#allocation2 + $0x4] sm:$0xf]  ;;  %v146_v8 = vmax.f32 %v144_v5, 0.0  ;;  %vm155_vm0 = vcmask 519168   ;;  %v2710_v31 = vmov 0.0   ;;  %vm180_vm1 = vcmask 1043456  }
  0xa3   :  { %v2877_v1 = vshrl.u32 %v149_v0, 7  ;;  %v147_v11 = vmax.f32 %v145_v7, 0.0  ;;  %1943 = vmatprep.subr.mxu1 %v2710_v31  ;;  %v2904_v32 = vld [vmem:[#allocation7] sm:$0xf]  ;;  %vm2711_vm2 = vmmov 0   ;;  %v596_v33 = vld [vmem:[#allocation11 + $0x8] sm:$0xff] }
  0xa4   :  { %1944 = vmatpush3.msk.msra.mxu1 %vm180_vm1, %v2904_v32  ;;  %1945 = vmatprep.mubr.msk.f32.mxu1 %vm2711_vm2, %v2710_v31  ;;  %v602_v34 = vld [vmem:[#allocation11 + $0x38] sm:$0xff]  ;;  %v595_v36 = vld [vmem:[#allocation11] sm:$0xff]  ;;  %v601_v37 = vld [vmem:[#allocation11 + $0x30] sm:$0xff]  ;;  %vm175_vm3 = vcmask 1041409   ;;  %vm177_vm4 = vcmask 31744   ;;  %vm1800_vm5 = vcmask 74752  }
  0xa5   :  { %v2880_v2 = vsub.s32 1, %v2877_v1  ;;  %v2883_v3 = vsub.s32 0, %v2877_v1  ;;  %v2886_v4 = vsub.s32 2, %v2877_v1  ;;  %v2892_v13 = vsub.s32 3, %v2877_v1  ;;  %1948 = vmatprep.subr.mxu1 %v2710_v31  ;;  %v608_v39 = vld [vmem:[#allocation11 + $0x68] sm:$0xff]  ;;  %v614_v40 = vld [vmem:[#allocation11 + $0x98] sm:$0xff] }
  0xa6   :  { %v1963_v35 = vpack.c.bf16 %v602_v34, %v596_v33  ;;  %v1965_v38 = vpack.c.bf16 %v601_v37, %v595_v36  ;;  %v1967_v41 = vpack.c.bf16 %v614_v40, %v608_v39  ;;  %v607_v42 = vld [vmem:[#allocation11 + $0x60] sm:$0xff]  ;;  %v613_v43 = vld [vmem:[#allocation11 + $0x90] sm:$0xff]  ;;  %v620_v45 = vld [vmem:[#allocation11 + $0xc8] sm:$0xff] }
  0xa7   :  { %v257_v9 = vrot.slane %v148_v6, %v2880_v2  ;;  %v152_v10 = vrot.slane %v148_v6, %v2883_v3  ;;  %v352_v12 = vrot.slane %v148_v6, %v2886_v4  ;;  %v447_v20 = vrot.slane %v148_v6, %v2892_v13  ;;  %v626_v46 = vld [vmem:[#allocation11 + $0xf8] sm:$0xff]  ;;  %v619_v48 = vld [vmem:[#allocation11 + $0xc0] sm:$0xff]  ;;  %v625_v49 = vld [vmem:[#allocation11 + $0xf0] sm:$0xff] }
  0xa8   :  { %1964 = vmatprep.subr.bf16.mxu0 %v1963_v35  ;;  %v1969_v44 = vpack.c.bf16 %v613_v43, %v607_v42  ;;  %v1971_v47 = vpack.c.bf16 %v626_v46, %v620_v45  ;;  %v1973_v50 = vpack.c.bf16 %v625_v49, %v619_v48  ;;  %v632_v51 = vld [vmem:[#allocation11 + $0x128] sm:$0xff]  ;;  %v638_v52 = vld [vmem:[#allocation11 + $0x158] sm:$0xff]  ;;  %v631_v54 = vld [vmem:[#allocation11 + $0x120] sm:$0xff] }
  0xa9   :  { %v258_v14 = vmul.f32 %v257_v9, %v146_v8  ;;  %v153_v15 = vmul.f32 %v152_v10, %v146_v8  ;;  %v259_v16 = vmul.f32 %v257_v9, %v147_v11  ;;  %v154_v17 = vmul.f32 %v152_v10, %v147_v11  ;;  %1966 = vmatpush1.bf16.msra.mxu0 %v1965_v38  ;;  %v637_v55 = vld [vmem:[#allocation11 + $0x150] sm:$0xff]  ;;  %v644_v57 = vld [vmem:[#allocation11 + $0x188] sm:$0xff]  ;;  %v650_v58 = vld [vmem:[#allocation11 + $0x1b8] sm:$0xff] }
  0xaa   :  { %v354_v23 = vmul.f32 %v352_v12, %v147_v11  ;;  %v353_v24 = vmul.f32 %v352_v12, %v146_v8  ;;  %v449_v27 = vmul.f32 %v447_v20, %v147_v11  ;;  %v448_v28 = vmul.f32 %v447_v20, %v146_v8  ;;  %1968 = vmatprep.subr.bf16.mxu0 %v1967_v41  ;;  %v643_v60 = vld [vmem:[#allocation11 + $0x180] sm:$0xff]  ;;  %v649_v61 = vld [vmem:[#allocation11 + $0x1b0] sm:$0xff]  ;;  %v656_v63 = vld [vmem:[#allocation11 + $0x1e8] sm:$0xff] }
  0xab   :  { %v260_v18 = vsel %vm155_vm0, %v258_v14, 0.0  ;;  %v156_v19 = vsel %vm155_vm0, %v153_v15, 0.0  ;;  %v263_v21 = vsel %vm155_vm0, %v259_v16, 0.0  ;;  %v159_v22 = vsel %vm155_vm0, %v154_v17, 0.0  ;;  %v662_v5 = vld [vmem:[#allocation11 + $0x218] sm:$0xff]  ;;  %v655_v7 = vld [vmem:[#allocation11 + $0x1e0] sm:$0xff] }
  0xac   :  { %261 = vadd.xlane.f32.xlu1 %v260_v18  ;;  %157 = vadd.xlane.f32.xlu0 %v156_v19  ;;  %v358_v25 = vsel %vm155_vm0, %v354_v23, 0.0  ;;  %v355_v26 = vsel %vm155_vm0, %v353_v24, 0.0  ;;  %v453_v29 = vsel %vm155_vm0, %v449_v27, 0.0  ;;  %v450_v30 = vsel %vm155_vm0, %v448_v28, 0.0  ;;  %v661_v8 = vld [vmem:[#allocation11 + $0x210] sm:$0xff]  ;;  %v668_v10 = vld [vmem:[#allocation11 + $0x248] sm:$0xff] }
  0xad   :  { %1970 = vmatpush1.bf16.msra.mxu0 %v1969_v44  ;;  %v1975_v53 = vpack.c.bf16 %v638_v52, %v632_v51  ;;  %v1977_v56 = vpack.c.bf16 %v637_v55, %v631_v54  ;;  %v1979_v59 = vpack.c.bf16 %v650_v58, %v644_v57  ;;  %v1981_v62 = vpack.c.bf16 %v649_v61, %v643_v60  ;;  %v674_v11 = vld [vmem:[#allocation11 + $0x278] sm:$0xff]  ;;  %v667_v14 = vld [vmem:[#allocation11 + $0x240] sm:$0xff]  ;;  %v673_v15 = vld [vmem:[#allocation11 + $0x270] sm:$0xff] }
  0xae   :  { %1972 = vmatprep.subr.bf16.mxu0 %v1971_v47  ;;  %v1983_v6 = vpack.c.bf16 %v662_v5, %v656_v63  ;;  %v1985_v9 = vpack.c.bf16 %v661_v8, %v655_v7  ;;  %v1987_v12 = vpack.c.bf16 %v674_v11, %v668_v10  ;;  %v1989_v16 = vpack.c.bf16 %v673_v15, %v667_v14  ;;  %v680_v17 = vld [vmem:[#allocation11 + $0x2a8] sm:$0xff]  ;;  %v686_v18 = vld [vmem:[#allocation11 + $0x2d8] sm:$0xff]  ;;  %v679_v20 = vld [vmem:[#allocation11 + $0x2a0] sm:$0xff] }
  0xaf   :  { %v1991_v19 = vpack.c.bf16 %v686_v18, %v680_v17  ;;  %v692_v23 = vld [vmem:[#allocation11 + $0x308] sm:$0xff]  ;;  %v698_v24 = vld [vmem:[#allocation11 + $0x338] sm:$0xff]  ;;  %v697_v27 = vld [vmem:[#allocation11 + $0x330] sm:$0xff]  ;;  %v166_v58 = vand.u32 127, %v149_v0 }
  0xb0   :  { %264 = vadd.xlane.f32.xlu1 %v263_v21  ;;  %160 = vadd.xlane.f32.xlu0 %v159_v22  ;;  %v685_v21 = vld [vmem:[#allocation11 + $0x2d0] sm:$0xff]  ;;  %v703_v34 = vld [vmem:[#allocation11 + $0x360] sm:$0xff]  ;;  %v716_v37 = vld [vmem:[#allocation11 + $0x3c8] sm:$0xff] }
  0xb1   :  { %1974 = vmatpush1.bf16.msra.mxu0 %v1973_v50  ;;  %v1993_v22 = vpack.c.bf16 %v685_v21, %v679_v20  ;;  %v709_v35 = vld [vmem:[#allocation11 + $0x390] sm:$0xff]  ;;  %v722_v38 = vld [vmem:[#allocation11 + $0x3f8] sm:$0xff]  ;;  %v715_v40 = vld [vmem:[#allocation11 + $0x3c0] sm:$0xff]  ;;  %v169_v61 = vsub.s32 %v166_v58, %v2877_v1 }
  0xb2   :  { %1976 = vmatprep.subr.bf16.mxu0 %v1975_v53  ;;  %v2001_v36 = vpack.c.bf16 %v709_v35, %v703_v34  ;;  %v2003_v39 = vpack.c.bf16 %v722_v38, %v716_v37  ;;  %v721_v41 = vld [vmem:[#allocation11 + $0x3f0] sm:$0xff]  ;;  %v728_v43 = vld [vmem:[#allocation11 + $0x428] sm:$0xff]  ;;  %v734_v44 = vld [vmem:[#allocation11 + $0x458] sm:$0xff] }
  0xb3   :  { %v2005_v42 = vpack.c.bf16 %v721_v41, %v715_v40  ;;  %v2007_v45 = vpack.c.bf16 %v734_v44, %v728_v43  ;;  %v727_v46 = vld [vmem:[#allocation11 + $0x420] sm:$0xff]  ;;  %v733_v47 = vld [vmem:[#allocation11 + $0x450] sm:$0xff]  ;;  %v740_v49 = vld [vmem:[#allocation11 + $0x488] sm:$0xff] }
  0xb4   :  { %359 = vadd.xlane.f32.xlu1 %v358_v25  ;;  %356 = vadd.xlane.f32.xlu0 %v355_v26  ;;  %v1995_v25 = vpack.c.bf16 %v698_v24, %v692_v23  ;;  %v691_v26 = vld [vmem:[#allocation11 + $0x300] sm:$0xff]  ;;  %v2009_v48 = vpack.c.bf16 %v733_v47, %v727_v46  ;;  %v746_v50 = vld [vmem:[#allocation11 + $0x4b8] sm:$0xff]  ;;  %v745_v53 = vld [vmem:[#allocation11 + $0x4b0] sm:$0xff] }
  0xb5   :  { %1978 = vmatpush1.bf16.msra.mxu0 %v1977_v56  ;;  %v1997_v28 = vpack.c.bf16 %v697_v27, %v691_v26  ;;  %v2011_v51 = vpack.c.bf16 %v746_v50, %v740_v49  ;;  %v739_v52 = vld [vmem:[#allocation11 + $0x480] sm:$0xff]  ;;  %v752_v55 = vld [vmem:[#allocation11 + $0x4e8] sm:$0xff]  ;;  %v758_v56 = vld [vmem:[#allocation11 + $0x518] sm:$0xff] }
  0xb6   :  { %1980 = vmatprep.subr.bf16.mxu0 %v1979_v59  ;;  %v2013_v54 = vpack.c.bf16 %v745_v53, %v739_v52  ;;  %v2015_v57 = vpack.c.bf16 %v758_v56, %v752_v55  ;;  %v598_v15 = vld [vmem:[#allocation11 + $0x18] sm:$0xff]  ;;  %v597_v23 = vld [vmem:[#allocation11 + $0x10] sm:$0xff]  ;;  %v603_v24 = vld [vmem:[#allocation11 + $0x40] sm:$0xff] }
  0xb7   :  { %v616_v26 = vld [vmem:[#allocation11 + $0xa8] sm:$0xff]  ;;  %v622_v34 = vld [vmem:[#allocation11 + $0xd8] sm:$0xff]  ;;  %v621_v38 = vld [vmem:[#allocation11 + $0xd0] sm:$0xff] }
  0xb8   :  { %454 = vadd.xlane.f32.xlu1 %v453_v29  ;;  %451 = vadd.xlane.f32.xlu0 %v450_v30  ;;  %v704_v29 = vld [vmem:[#allocation11 + $0x368] sm:$0xff]  ;;  %v710_v30 = vld [vmem:[#allocation11 + $0x398] sm:$0xff]  ;;  %v639_v43 = vld [vmem:[#allocation11 + $0x160] sm:$0xff] }
  0xb9   :  { %1982 = vmatpush1.bf16.msra.mxu0 %v1981_v62  ;;  %v1999_v33 = vpack.c.bf16 %v710_v30, %v704_v29  ;;  %v609_v30 = vld [vmem:[#allocation11 + $0x70] sm:$0xff]  ;;  %v628_v35 = vld [vmem:[#allocation11 + $0x108] sm:$0xff]  ;;  %v634_v40 = vld [vmem:[#allocation11 + $0x138] sm:$0xff] }
  0xba   :  { %1984 = vmatprep.subr.bf16.mxu0 %v1983_v6  ;;  %v2099_v37 = vpack.c.bf16 %v628_v35, %v622_v34  ;;  %v646_v44 = vld [vmem:[#allocation11 + $0x198] sm:$0xff]  ;;  %v651_v49 = vld [vmem:[#allocation11 + $0x1c0] sm:$0xff] }
  0xbb   :  { %v658_v50 = vld [vmem:[#allocation11 + $0x1f8] sm:$0xff]  ;;  %v663_v55 = vld [vmem:[#allocation11 + $0x220] sm:$0xff] }
  0xbc   :  { %v670_v56 = vld [vmem:[#allocation11 + $0x258] sm:$0xff]  ;;  %v735_v34 = vld [vmem:[#allocation11 + $0x460] sm:$0xff] }
  0xbd   :  { %1986 = vmatpush1.bf16.msra.mxu0 %v1985_v9  ;;  %v742_v35 = vld [vmem:[#allocation11 + $0x498] sm:$0xff] }
  0xbe   :  { %1988 = vmatprep.subr.bf16.mxu0 %v1987_v12 }
  0xc1   :  { %1990 = vmatpush1.bf16.msra.mxu0 %v1989_v16  ;;  %v604_v16 = vld [vmem:[#allocation11 + $0x48] sm:$0xff] }
  0xc2   :  { %1992 = vmatprep.subr.bf16.mxu0 %v1991_v19 }
  0xc5   :  { %1994 = vmatpush1.bf16.msra.mxu0 %v1993_v22  ;;  %v2091_v22 = vpack.c.bf16 %v604_v16, %v598_v15  ;;  %v706_v15 = vld [vmem:[#allocation11 + $0x378] sm:$0xff]  ;;  %v712_v16 = vld [vmem:[#allocation11 + $0x3a8] sm:$0xff] }
  0xc6   :  { %1996 = vmatprep.subr.bf16.mxu0 %v1995_v25  ;;  %v610_v25 = vld [vmem:[#allocation11 + $0x78] sm:$0xff] }
  0xc7   :  { %v2095_v29 = vpack.c.bf16 %v616_v26, %v610_v25  ;;  %v717_v25 = vld [vmem:[#allocation11 + $0x3d0] sm:$0xff]  ;;  %v723_v26 = vld [vmem:[#allocation11 + $0x400] sm:$0xff] }
  0xc9   :  { %1998 = vmatpush1.bf16.msra.mxu0 %v1997_v28  ;;  %v2093_v28 = vpack.c.bf16 %v603_v24, %v597_v23 }
  0xca   :  { %2000 = vmatprep.subr.bf16.mxu0 %v1999_v33  ;;  %v615_v33 = vld [vmem:[#allocation11 + $0xa0] sm:$0xff] }
  0xcd   :  { %2002 = vmatpush1.bf16.msra.mxu0 %v2001_v36  ;;  %v2097_v36 = vpack.c.bf16 %v615_v33, %v609_v30  ;;  %v729_v33 = vld [vmem:[#allocation11 + $0x430] sm:$0xff] }
  0xce   :  { %2004 = vmatprep.subr.bf16.mxu0 %v2003_v39  ;;  %v627_v39 = vld [vmem:[#allocation11 + $0x100] sm:$0xff] }
  0xcf   :  { %v2101_v41 = vpack.c.bf16 %v627_v39, %v621_v38  ;;  %v741_v39 = vld [vmem:[#allocation11 + $0x490] sm:$0xff] }
  0xd1   :  { %2006 = vmatpush1.bf16.msra.mxu0 %v2005_v42  ;;  %v633_v42 = vld [vmem:[#allocation11 + $0x130] sm:$0xff] }
  0xd2   :  { %2008 = vmatprep.subr.bf16.mxu0 %v2007_v45  ;;  %v652_v45 = vld [vmem:[#allocation11 + $0x1c8] sm:$0xff]  ;;  %v2105_v46 = vpack.c.bf16 %v639_v43, %v633_v42  ;;  %v751_v43 = vld [vmem:[#allocation11 + $0x4e0] sm:$0xff] }
  0xd3   :  { %v2107_v47 = vpack.c.bf16 %v652_v45, %v646_v44  ;;  %v757_v44 = vld [vmem:[#allocation11 + $0x510] sm:$0xff] }
  0xd4   :  { %v753_v45 = vld [vmem:[#allocation11 + $0x4f0] sm:$0xff] }
  0xd5   :  { %2010 = vmatpush1.bf16.msra.mxu0 %v2009_v48  ;;  %v645_v48 = vld [vmem:[#allocation11 + $0x190] sm:$0xff] }
  0xd6   :  { %2012 = vmatprep.subr.bf16.mxu0 %v2011_v51  ;;  %v664_v51 = vld [vmem:[#allocation11 + $0x228] sm:$0xff]  ;;  %v2109_v52 = vpack.c.bf16 %v651_v49, %v645_v48 }
  0xd7   :  { %v2111_v53 = vpack.c.bf16 %v664_v51, %v658_v50  ;;  %v764_v49 = vld [vmem:[#allocation11 + $0x548] sm:$0xff]  ;;  %v770_v50 = vld [vmem:[#allocation11 + $0x578] sm:$0xff] }
  0xd8   :  { %v2019_v51 = vpack.c.bf16 %v770_v50, %v764_v49  ;;  %v805_v49 = vld [vmem:[#allocation11 + $0x690] sm:$0xff] }
  0xd9   :  { %2014 = vmatpush1.bf16.msra.mxu0 %v2013_v54  ;;  %v657_v54 = vld [vmem:[#allocation11 + $0x1f0] sm:$0xff] }
  0xda   :  { %2016 = vmatprep.subr.bf16.mxu0 %v2015_v57  ;;  %v676_v57 = vld [vmem:[#allocation11 + $0x288] sm:$0xff]  ;;  %v2113_v58 = vpack.c.bf16 %v663_v55, %v657_v54  ;;  %v763_v54 = vld [vmem:[#allocation11 + $0x540] sm:$0xff] }
 0x139   :  { %v262_v59 = vpop.xlane.xlu1 %261  ;;  %v158_v60 = vpop.xlane.xlu0 %157 }
 0x13a   :  { %v170_v5 = vrot.slane %v158_v60, %v169_v61  ;;  %v271_v7 = vrot.slane %v262_v59, %v169_v61  ;;  %v2115_v59 = vpack.c.bf16 %v676_v57, %v670_v56  ;;  %v669_v60 = vld [vmem:[#allocation11 + $0x250] sm:$0xff] }
 0x13b   :  { %v769_v56 = vld [vmem:[#allocation11 + $0x570] sm:$0xff] }
 0x13c   :  { %v765_v57 = vld [vmem:[#allocation11 + $0x550] sm:$0xff] }
 0x13d   :  { %v265_v62 = vpop.xlane.xlu1 %264  ;;  %v161_v63 = vpop.xlane.xlu0 %160 }
 0x13e   :  { %v174_v6 = vrot.slane %v161_v63, %v169_v61  ;;  %v275_v8 = vrot.slane %v265_v62, %v169_v61  ;;  %v682_v62 = vld [vmem:[#allocation11 + $0x2b8] sm:$0xff]  ;;  %v688_v63 = vld [vmem:[#allocation11 + $0x2e8] sm:$0xff] }
 0x140   :  { %v176_v9 = vsel %vm175_vm3, %v174_v6, %v170_v5  ;;  %v276_v14 = vsel %vm175_vm3, %v275_v8, %v271_v7  ;;  %v2119_v6 = vpack.c.bf16 %v688_v63, %v682_v62  ;;  %v681_v7 = vld [vmem:[#allocation11 + $0x2b0] sm:$0xff]  ;;  %v687_v8 = vld [vmem:[#allocation11 + $0x2e0] sm:$0xff]  ;;  %v782_v62 = vld [vmem:[#allocation11 + $0x5d8] sm:$0xff] }
 0x141   :  { %1946 = vmatmul.mubr.msk.f32.vlgmr.msra.gmra.mrb[0].mxu1 %vm177_vm4, %v176_v9  ;;  %v360_v10 = vpop.xlane.xlu1 %359  ;;  %v357_v11 = vpop.xlane.xlu0 %356  ;;  %v694_v9 = vld [vmem:[#allocation11 + $0x318] sm:$0xff] }
 0x142   :  { %1949 = vmatpush3.msk.msra.mxu1 %vm180_vm1, %v2904_v32  ;;  %1950 = vmatprep.mubr.msk.f32.mxu1 %vm2711_vm2, %v2710_v31  ;;  %v370_v0 = vrot.slane %v360_v10, %v169_v61  ;;  %v366_v12 = vrot.slane %v357_v11, %v169_v61  ;;  %v700_v10 = vld [vmem:[#allocation11 + $0x348] sm:$0xff]  ;;  %v2121_v11 = vpack.c.bf16 %v687_v8, %v681_v7  ;;  %v778_v63 = vld [vmem:[#allocation11 + $0x5b8] sm:$0xff]  ;;  %v775_v7 = vld [vmem:[#allocation11 + $0x5a0] sm:$0xff] }
 0x143   :  { %1953 = vmatprep.subr.mxu1 %v2710_v31  ;;  %v781_v8 = vld [vmem:[#allocation11 + $0x5d0] sm:$0xff] }
 0x144   :  { %v371_v19 = vsel %vm175_vm3, %v370_v0, %v366_v12  ;;  %v2123_v0 = vpack.c.bf16 %v700_v10, %v694_v9  ;;  %v693_v12 = vld [vmem:[#allocation11 + $0x310] sm:$0xff]  ;;  %v2025_v10 = vpack.c.bf16 %v781_v8, %v775_v7  ;;  %v811_v8 = vld [vmem:[#allocation11 + $0x6c0] sm:$0xff] }
 0x145   :  { %1951 = vmatmul.mubr.msk.f32.vlgmr.msra.gmra.mrb[2].mxu1 %vm177_vm4, %v276_v14  ;;  %v455_v17 = vpop.xlane.xlu1 %454  ;;  %v452_v18 = vpop.xlane.xlu0 %451  ;;  %v699_v14 = vld [vmem:[#allocation11 + $0x340] sm:$0xff] }
 0x146   :  { %1954 = vmatpush3.msk.msra.mxu1 %vm180_vm1, %v2904_v32  ;;  %1955 = vmatprep.mubr.msk.f32.mxu1 %vm2711_vm2, %v2710_v31  ;;  %v465_v20 = vrot.slane %v455_v17, %v169_v61  ;;  %v461_v21 = vrot.slane %v452_v18, %v169_v61  ;;  %v675_v61 = vld [vmem:[#allocation11 + $0x280] sm:$0xff]  ;;  %v2125_v17 = vpack.c.bf16 %v699_v14, %v693_v12  ;;  %v788_v14 = vld [vmem:[#allocation11 + $0x608] sm:$0xff] }
 0x147   :  { %1958 = vmatprep.subr.mxu1 %v2710_v31  ;;  %v2117_v5 = vpack.c.bf16 %v675_v61, %v669_v60  ;;  %v2127_v18 = vpack.c.bf16 %v712_v16, %v706_v15  ;;  %v776_v61 = vld [vmem:[#allocation11 + $0x5a8] sm:$0xff]  ;;  %v794_v15 = vld [vmem:[#allocation11 + $0x638] sm:$0xff] }
 0x148   :  { %v466_v27 = vsel %vm175_vm3, %v465_v20, %v461_v21  ;;  %v711_v20 = vld [vmem:[#allocation11 + $0x3a0] sm:$0xff]  ;;  %v718_v21 = vld [vmem:[#allocation11 + $0x3d8] sm:$0xff] }
 0x149   :  { %1956 = vmatmul.mubr.msk.f32.vlgmr.msra.gmra.mrb[4].mxu1 %vm177_vm4, %v371_v19  ;;  %v705_v19 = vld [vmem:[#allocation11 + $0x370] sm:$0xff]  ;;  %v790_v16 = vld [vmem:[#allocation11 + $0x618] sm:$0xff] }
 0x14a   :  { %1959 = vmatpush3.msk.msra.mxu1 %vm180_vm1, %v2904_v32  ;;  %1960 = vmatprep.mubr.msk.f32.mxu1 %vm2711_vm2, %v2710_v31  ;;  %v640_v32 = vld [vmem:[#allocation11 + $0x168] sm:$0xff]  ;;  %v2129_v23 = vpack.c.bf16 %v711_v20, %v705_v19  ;;  %v539_v20 = vld [vmem:[#allocation8] sm:$0xf] }
 0x14b   :  { %2092 = vmatprep.subr.bf16.mxu1 %v2091_v22  ;;  %v2103_v31 = vpack.c.bf16 %v640_v32, %v634_v40  ;;  %v724_v22 = vld [vmem:[#allocation11 + $0x408] sm:$0xff]  ;;  %v747_v40 = vld [vmem:[#allocation11 + $0x4c0] sm:$0xff]  ;;  %v754_v32 = vld [vmem:[#allocation11 + $0x4f8] sm:$0xff] }
 0x14c   :  { %v2131_v24 = vpack.c.bf16 %v724_v22, %v718_v21  ;;  %v544_v21 = vrot.slane %v539_v20, %v2883_v3  ;;  %v2936_v22 = vld [vmem:[#allocation10] sm:$0xf] }
 0x14d   :  { %1961 = vmatmul.mubr.msk.f32.vlgmr.msra.gmra.mrb[6].mxu1 %vm177_vm4, %v466_v27  ;;  %v730_v27 = vld [vmem:[#allocation11 + $0x438] sm:$0xff] }
 0x14e   :  { %2094 = vmatpush1.bf16.msra.mxu1 %v2093_v28  ;;  %v736_v28 = vld [vmem:[#allocation11 + $0x468] sm:$0xff] }
 0x14f   :  { %2096 = vmatprep.subr.bf16.mxu1 %v2095_v29  ;;  %v2133_v29 = vpack.c.bf16 %v723_v26, %v717_v25  ;;  %v2135_v30 = vpack.c.bf16 %v736_v28, %v730_v27  ;;  %v548_v25 = vrot.slane %v539_v20, %v2880_v2  ;;  %v570_v27 = vrot.slane %v2936_v22, %v2883_v3 }
 0x150   :  { %v574_v28 = vrot.slane %v2936_v22, %v2880_v2 }
 0x152   :  { %2098 = vmatpush1.bf16.msra.mxu1 %v2097_v36  ;;  %v748_v36 = vld [vmem:[#allocation11 + $0x4c8] sm:$0xff] }
 0x153   :  { %2100 = vmatprep.subr.bf16.mxu1 %v2099_v37  ;;  %v2137_v37 = vpack.c.bf16 %v735_v34, %v729_v33  ;;  %v2139_v38 = vpack.c.bf16 %v748_v36, %v742_v35  ;;  %v787_v34 = vld [vmem:[#allocation11 + $0x600] sm:$0xff]  ;;  %v793_v35 = vld [vmem:[#allocation11 + $0x630] sm:$0xff]  ;;  %v552_v36 = vrot.slane %v539_v20, %v2886_v4 }
 0x156   :  { %2102 = vmatpush1.bf16.msra.mxu1 %v2101_v41  ;;  %v760_v41 = vld [vmem:[#allocation11 + $0x528] sm:$0xff] }
 0x157   :  { %2104 = vmatprep.subr.bf16.mxu1 %v2103_v31  ;;  %v2141_v31 = vpack.c.bf16 %v747_v40, %v741_v39  ;;  %v2143_v42 = vpack.c.bf16 %v760_v41, %v754_v32  ;;  %v795_v39 = vld [vmem:[#allocation11 + $0x640] sm:$0xff]  ;;  %v800_v40 = vld [vmem:[#allocation11 + $0x668] sm:$0xff]  ;;  %v806_v41 = vld [vmem:[#allocation11 + $0x698] sm:$0xff] }
 0x15a   :  { %2106 = vmatpush1.bf16.msra.mxu1 %v2105_v46  ;;  %v2017_v46 = vpack.c.bf16 %v757_v44, %v751_v43  ;;  %v578_v43 = vrot.slane %v2936_v22, %v2886_v4  ;;  %v2029_v44 = vpack.c.bf16 %v793_v35, %v787_v34  ;;  %v838_v34 = vld [vmem:[#allocation11 + $0x798] sm:$0xff]  ;;  %v844_v35 = vld [vmem:[#allocation11 + $0x7c8] sm:$0xff] }
 0x15b   :  { %2108 = vmatprep.subr.bf16.mxu1 %v2107_v47  ;;  %v759_v47 = vld [vmem:[#allocation11 + $0x520] sm:$0xff] }
 0x15c   :  { %v2145_v48 = vpack.c.bf16 %v759_v47, %v753_v45  ;;  %2018 = vmatpush1.bf16.msra.mxu0 %v2017_v46 }
 0x15d   :  { %2020 = vmatprep.subr.bf16.mxu0 %v2019_v51 }
 0x15e   :  { %2110 = vmatpush1.bf16.msra.mxu1 %v2109_v52  ;;  %v766_v52 = vld [vmem:[#allocation11 + $0x558] sm:$0xff] }
 0x15f   :  { %2112 = vmatprep.subr.bf16.mxu1 %v2111_v53  ;;  %v772_v53 = vld [vmem:[#allocation11 + $0x588] sm:$0xff] }
 0x160   :  { %v2147_v55 = vpack.c.bf16 %v772_v53, %v766_v52  ;;  %v556_v52 = vrot.slane %v539_v20, %v2892_v13 }
 0x162   :  { %2114 = vmatpush1.bf16.msra.mxu1 %v2113_v58  ;;  %v771_v58 = vld [vmem:[#allocation11 + $0x580] sm:$0xff] }
 0x163   :  { %2116 = vmatprep.subr.bf16.mxu1 %v2115_v59  ;;  %v2021_v59 = vpack.c.bf16 %v769_v56, %v763_v54  ;;  %v2149_v60 = vpack.c.bf16 %v771_v58, %v765_v57  ;;  %v2031_v54 = vpack.c.bf16 %v806_v41, %v800_v40  ;;  %v801_v56 = vld [vmem:[#allocation11 + $0x670] sm:$0xff]  ;;  %v807_v57 = vld [vmem:[#allocation11 + $0x6a0] sm:$0xff]  ;;  %v812_v58 = vld [vmem:[#allocation11 + $0x6c8] sm:$0xff] }
 0x164   :  { %v2161_v7 = vpack.c.bf16 %v807_v57, %v801_v56  ;;  %v837_v41 = vld [vmem:[#allocation11 + $0x790] sm:$0xff]  ;;  %v860_v56 = vld [vmem:[#allocation11 + $0x848] sm:$0xff]  ;;  %v866_v57 = vld [vmem:[#allocation11 + $0x878] sm:$0xff] }
 0x165   :  { %2022 = vmatpush1.bf16.msra.mxu0 %v2021_v59  ;;  %v818_v59 = vld [vmem:[#allocation11 + $0x6f8] sm:$0xff] }
 0x166   :  { %2118 = vmatpush1.bf16.msra.mxu1 %v2117_v5  ;;  %v2023_v5 = vpack.c.bf16 %v782_v62, %v776_v61  ;;  %v820_v61 = vld [vmem:[#allocation11 + $0x708] sm:$0xff] }
 0x167   :  { %2120 = vmatprep.subr.bf16.mxu1 %v2119_v6  ;;  %v784_v6 = vld [vmem:[#allocation11 + $0x5e8] sm:$0xff] }
 0x168   :  { %v2151_v9 = vpack.c.bf16 %v784_v6, %v778_v63  ;;  %2024 = vmatprep.subr.bf16.mxu0 %v2023_v5  ;;  %v582_v63 = vrot.slane %v2936_v22, %v2892_v13 }
 0x169   :  { %2026 = vmatpush1.bf16.msra.mxu0 %v2025_v10 }
 0x16a   :  { %2122 = vmatpush1.bf16.msra.mxu1 %v2121_v11  ;;  %v777_v11 = vld [vmem:[#allocation11 + $0x5b0] sm:$0xff] }
 0x16b   :  { %2124 = vmatprep.subr.bf16.mxu1 %v2123_v0  ;;  %v783_v0 = vld [vmem:[#allocation11 + $0x5e0] sm:$0xff] }
 0x16c   :  { %v2153_v12 = vpack.c.bf16 %v783_v0, %v777_v11  ;;  %v2035_v0 = vpack.c.bf16 %v818_v59, %v812_v58  ;;  %v862_v58 = vld [vmem:[#allocation11 + $0x858] sm:$0xff]  ;;  %v868_v59 = vld [vmem:[#allocation11 + $0x888] sm:$0xff] }
 0x16e   :  { %2126 = vmatpush1.bf16.msra.mxu1 %v2125_v17  ;;  %v2027_v17 = vpack.c.bf16 %v794_v15, %v788_v14  ;;  %v813_v14 = vld [vmem:[#allocation11 + $0x6d0] sm:$0xff]  ;;  %v819_v15 = vld [vmem:[#allocation11 + $0x700] sm:$0xff] }
 0x16f   :  { %2128 = vmatprep.subr.bf16.mxu1 %v2127_v18  ;;  %v796_v18 = vld [vmem:[#allocation11 + $0x648] sm:$0xff]  ;;  %v2165_v22 = vpack.c.bf16 %v819_v15, %v813_v14 }
 0x170   :  { %v2155_v19 = vpack.c.bf16 %v796_v18, %v790_v16  ;;  %2028 = vmatprep.subr.bf16.mxu0 %v2027_v17  ;;  %v824_v16 = vld [vmem:[#allocation11 + $0x728] sm:$0xff]  ;;  %v830_v17 = vld [vmem:[#allocation11 + $0x758] sm:$0xff] }
 0x171   :  { %v826_v18 = vld [vmem:[#allocation11 + $0x738] sm:$0xff] }
 0x172   :  { %2130 = vmatpush1.bf16.msra.mxu1 %v2129_v23 }
 0x173   :  { %2132 = vmatprep.subr.bf16.mxu1 %v2131_v24 }
 0x176   :  { %2134 = vmatpush1.bf16.msra.mxu1 %v2133_v29 }
 0x177   :  { %2136 = vmatprep.subr.bf16.mxu1 %v2135_v30 }
 0x17a   :  { %2138 = vmatpush1.bf16.msra.mxu1 %v2137_v37 }
 0x17b   :  { %2140 = vmatprep.subr.bf16.mxu1 %v2139_v38  ;;  %v789_v38 = vld [vmem:[#allocation11 + $0x610] sm:$0xff] }
 0x17c   :  { %v2157_v47 = vpack.c.bf16 %v795_v39, %v789_v38  ;;  %v835_v38 = vld [vmem:[#allocation11 + $0x780] sm:$0xff]  ;;  %v841_v39 = vld [vmem:[#allocation11 + $0x7b0] sm:$0xff] }
 0x17e   :  { %2142 = vmatpush1.bf16.msra.mxu1 %v2141_v31  ;;  %v802_v31 = vld [vmem:[#allocation11 + $0x678] sm:$0xff] }
 0x17f   :  { %2144 = vmatprep.subr.bf16.mxu1 %v2143_v42  ;;  %v808_v42 = vld [vmem:[#allocation11 + $0x6a8] sm:$0xff] }
 0x182   :  { %2146 = vmatpush1.bf16.msra.mxu1 %v2145_v48  ;;  %v799_v48 = vld [vmem:[#allocation11 + $0x660] sm:$0xff] }
 0x183   :  { %2148 = vmatprep.subr.bf16.mxu1 %v2147_v55  ;;  %v2159_v55 = vpack.c.bf16 %v808_v42, %v802_v31  ;;  %v2033_v6 = vpack.c.bf16 %v805_v49, %v799_v48  ;;  %v843_v31 = vld [vmem:[#allocation11 + $0x7c0] sm:$0xff]  ;;  %v848_v42 = vld [vmem:[#allocation11 + $0x7e8] sm:$0xff] }
 0x184   :  { %v2173_v48 = vpack.c.bf16 %v843_v31, %v837_v41  ;;  %v847_v49 = vld [vmem:[#allocation11 + $0x7e0] sm:$0xff] }
 0x185   :  { %v895_v31 = vld [vmem:[#allocation11 + $0x960] sm:$0xff] }
 0x186   :  { %2150 = vmatpush1.bf16.msra.mxu1 %v2149_v60  ;;  %v814_v60 = vld [vmem:[#allocation11 + $0x6d8] sm:$0xff] }
 0x187   :  { %2152 = vmatprep.subr.bf16.mxu1 %v2151_v9  ;;  %v817_v9 = vld [vmem:[#allocation11 + $0x6f0] sm:$0xff] }
 0x18a   :  { %2154 = vmatpush1.bf16.msra.mxu1 %v2153_v12  ;;  %v2163_v12 = vpack.c.bf16 %v820_v61, %v814_v60 }
 0x18b   :  { %2156 = vmatprep.subr.bf16.mxu1 %v2155_v19  ;;  %v832_v19 = vld [vmem:[#allocation11 + $0x768] sm:$0xff] }
 0x214   :  { %v250_v23 = vpop.f32.mrb[0].mxu1 }
 0x215   :  { %v1947_v24 = vpop.f32.mrb[1].mxu1  ;;  %v561_v26 = vmul.f32 %v544_v21, %v250_v23  ;;  %v2037_v21 = vpack.c.bf16 %v817_v9, %v811_v8  ;;  %v823_v23 = vld [vmem:[#allocation11 + $0x720] sm:$0xff]  ;;  %v861_v8 = vld [vmem:[#allocation11 + $0x850] sm:$0xff] }
 0x216   :  { %v829_v24 = vld [vmem:[#allocation11 + $0x750] sm:$0xff]  ;;  %v867_v9 = vld [vmem:[#allocation11 + $0x880] sm:$0xff] }
 0x217   :  { %v587_v37 = vadd.f32 %v570_v27, %v561_v26  ;;  %v2039_v26 = vpack.c.bf16 %v830_v17, %v824_v16  ;;  %v2167_v27 = vpack.c.bf16 %v832_v19, %v826_v18  ;;  %v2181_v15 = vpack.c.bf16 %v867_v9, %v861_v8  ;;  %v871_v16 = vld [vmem:[#allocation11 + $0x8a0] sm:$0xff]  ;;  %v877_v17 = vld [vmem:[#allocation11 + $0x8d0] sm:$0xff] }
 0x218   :  { %v345_v29 = vpop.f32.mrb[2].mxu1  ;;  %v919_v9 = vld [vmem:[#allocation11 + $0xa20] sm:$0xff] }
 0x219   :  { %v562_v30 = vmul.f32 %v548_v25, %v345_v29  ;;  %v1952_v33 = vpop.f32.mrb[3].mxu1  ;;  %v2949_v53 = vmax.f32 %v587_v37, 0.0  ;;  %v831_v29 = vld [vmem:[#allocation11 + $0x760] sm:$0xff] }
 0x21a   :  { %v842_v33 = vld [vmem:[#allocation11 + $0x7b8] sm:$0xff] }
 0x21b   :  { %v588_v32 = vadd.f32 %v574_v28, %v562_v30  ;;  %v825_v28 = vld [vmem:[#allocation11 + $0x730] sm:$0xff]  ;;  %v836_v30 = vld [vmem:[#allocation11 + $0x788] sm:$0xff] }
 0x21c   :  { %v440_v45 = vpop.f32.mrb[4].mxu1  ;;  %v2169_v37 = vpack.c.bf16 %v831_v29, %v825_v28  ;;  %v2043_v40 = vpack.c.bf16 %v842_v33, %v836_v30  ;;  %v883_v29 = vld [vmem:[#allocation11 + $0x900] sm:$0xff]  ;;  %v889_v30 = vld [vmem:[#allocation11 + $0x930] sm:$0xff] }
 0x21d   :  { %v2946_v46 = vmax.f32 %v588_v32, 0.0  ;;  %v563_v50 = vmul.f32 %v552_v36, %v440_v45  ;;  %v1957_v51 = vpop.f32.mrb[5].mxu1  ;;  %v2041_v36 = vpack.c.bf16 %v829_v24, %v823_v23  ;;  %v2171_v32 = vpack.c.bf16 %v844_v35, %v838_v34  ;;  %v856_v45 = vld [vmem:[#allocation11 + $0x828] sm:$0xff]  ;;  %v890_v23 = vld [vmem:[#allocation11 + $0x938] sm:$0xff]  ;;  %v885_v35 = vld [vmem:[#allocation11 + $0x910] sm:$0xff] }
 0x21e   :  { %v886_v24 = vld [vmem:[#allocation11 + $0x918] sm:$0xff] }
 0x21f   :  { %1043 = vmatprep.mubr.f32.mxu0 %v2946_v46  ;;  %1185 = vmatprep.mubr.f32.mxu1 %v2946_v46  ;;  %v2953_v62 = vadd.f32 %v578_v43, %v563_v50  ;;  %v854_v43 = vld [vmem:[#allocation11 + $0x818] sm:$0xff]  ;;  %v853_v50 = vld [vmem:[#allocation11 + $0x810] sm:$0xff] }
 0x220   :  { %1044 = vmatmul.mubr.f32.vlgmr.msra.gmra.mrb[0].mxu0 %v2949_v53  ;;  %1186 = vmatmul.mubr.f32.vlgmr.msra.gmra.mrb[8].mxu1 %v2949_v53  ;;  %v535_v5 = vpop.f32.mrb[6].mxu1  ;;  %v2047_v51 = vpack.c.bf16 %v854_v43, %v848_v42  ;;  %v2049_v60 = vpack.c.bf16 %v853_v50, %v847_v49  ;;  %v901_v42 = vld [vmem:[#allocation11 + $0x990] sm:$0xff]  ;;  %v914_v49 = vld [vmem:[#allocation11 + $0x9f8] sm:$0xff] }
 0x221   :  { %2030 = vmatpush1.bf16.msra.mxu0 %v2029_v44  ;;  %2158 = vmatpush1.bf16.msra.mxu1 %v2157_v47  ;;  %v564_v10 = vmul.f32 %v556_v52, %v535_v5  ;;  %v1962_v11 = vpop.f32.mrb[7].mxu1  ;;  %v850_v44 = vld [vmem:[#allocation11 + $0x7f8] sm:$0xff]  ;;  %v2045_v47 = vpack.c.bf16 %v841_v39, %v835_v38  ;;  %v865_v5 = vld [vmem:[#allocation11 + $0x870] sm:$0xff] }
 0x222   :  { %2032 = vmatprep.subr.bf16.mxu0 %v2031_v54  ;;  %2160 = vmatprep.subr.bf16.mxu1 %v2159_v55  ;;  %v2175_v52 = vpack.c.bf16 %v856_v45, %v850_v44  ;;  %v849_v54 = vld [vmem:[#allocation11 + $0x7f0] sm:$0xff]  ;;  %v855_v55 = vld [vmem:[#allocation11 + $0x820] sm:$0xff]  ;;  %v878_v11 = vld [vmem:[#allocation11 + $0x8d8] sm:$0xff] }
 0x223   :  { %v590_v20 = vadd.f32 %v582_v63, %v564_v10  ;;  %v2177_v61 = vpack.c.bf16 %v855_v55, %v849_v54  ;;  %v859_v63 = vld [vmem:[#allocation11 + $0x840] sm:$0xff]  ;;  %v872_v10 = vld [vmem:[#allocation11 + $0x8a8] sm:$0xff]  ;;  %v902_v38 = vld [vmem:[#allocation11 + $0x998] sm:$0xff] }
 0x224   :  { %v2053_v14 = vpack.c.bf16 %v865_v5, %v859_v63  ;;  %v2055_v18 = vpack.c.bf16 %v878_v11, %v872_v10  ;;  %v898_v39 = vld [vmem:[#allocation11 + $0x978] sm:$0xff]  ;;  %v897_v45 = vld [vmem:[#allocation11 + $0x970] sm:$0xff]  ;;  %v907_v55 = vld [vmem:[#allocation11 + $0x9c0] sm:$0xff] }
 0x225   :  { %2034 = vmatpush1.bf16.msra.mxu0 %v2033_v6  ;;  %2162 = vmatpush1.bf16.msra.mxu1 %v2161_v7  ;;  %v2959_v25 = vmax.f32 %v590_v20, 0.0  ;;  %v2051_v6 = vpack.c.bf16 %v866_v57, %v860_v56  ;;  %v2179_v7 = vpack.c.bf16 %v868_v59, %v862_v58  ;;  %v873_v20 = vld [vmem:[#allocation11 + $0x8b0] sm:$0xff]  ;;  %v910_v50 = vld [vmem:[#allocation11 + $0x9d8] sm:$0xff] }
 0x226   :  { %2036 = vmatprep.subr.bf16.mxu0 %v2035_v0  ;;  %2164 = vmatprep.subr.bf16.mxu1 %v2163_v12  ;;  %v874_v0 = vld [vmem:[#allocation11 + $0x8b8] sm:$0xff]  ;;  %v880_v12 = vld [vmem:[#allocation11 + $0x8e8] sm:$0xff]  ;;  %v913_v56 = vld [vmem:[#allocation11 + $0x9f0] sm:$0xff] }
 0x227   :  { %1114 = vmatprep.mubr.f32.mxu0 %v2959_v25  ;;  %1256 = vmatprep.mubr.f32.mxu1 %v2959_v25  ;;  %v2183_v19 = vpack.c.bf16 %v880_v12, %v874_v0  ;;  %v909_v59 = vld [vmem:[#allocation11 + $0x9d0] sm:$0xff]  ;;  %v926_v63 = vld [vmem:[#allocation11 + $0xa58] sm:$0xff] }
 0x228   :  { %v922_v5 = vld [vmem:[#allocation11 + $0xa38] sm:$0xff]  ;;  %v925_v10 = vld [vmem:[#allocation11 + $0xa50] sm:$0xff] }
 0x229   :  { %2038 = vmatpush1.bf16.msra.mxu0 %v2037_v21  ;;  %2166 = vmatpush1.bf16.msra.mxu1 %v2165_v22  ;;  %v879_v21 = vld [vmem:[#allocation11 + $0x8e0] sm:$0xff]  ;;  %v884_v22 = vld [vmem:[#allocation11 + $0x908] sm:$0xff]  ;;  %v921_v12 = vld [vmem:[#allocation11 + $0xa30] sm:$0xff] }
 0x22a   :  { %2040 = vmatprep.subr.bf16.mxu0 %v2039_v26  ;;  %2168 = vmatprep.subr.bf16.mxu1 %v2167_v27  ;;  %v892_v26 = vld [vmem:[#allocation11 + $0x948] sm:$0xff]  ;;  %v2057_v27 = vpack.c.bf16 %v877_v17, %v871_v16  ;;  %v2185_v28 = vpack.c.bf16 %v879_v21, %v873_v20  ;;  %v2059_v33 = vpack.c.bf16 %v890_v23, %v884_v22  ;;  %v938_v16 = vld [vmem:[#allocation11 + $0xab8] sm:$0xff]  ;;  %v931_v21 = vld [vmem:[#allocation11 + $0xa80] sm:$0xff] }
 0x22b   :  { %v2187_v34 = vpack.c.bf16 %v892_v26, %v886_v24  ;;  %v934_v17 = vld [vmem:[#allocation11 + $0xa98] sm:$0xff]  ;;  %v937_v22 = vld [vmem:[#allocation11 + $0xab0] sm:$0xff] }
 0x22c   :  { %v933_v26 = vld [vmem:[#allocation11 + $0xa90] sm:$0xff] }
 0x22d   :  { %2042 = vmatpush1.bf16.msra.mxu0 %v2041_v36  ;;  %2170 = vmatpush1.bf16.msra.mxu1 %v2169_v37  ;;  %v891_v36 = vld [vmem:[#allocation11 + $0x940] sm:$0xff]  ;;  %v896_v37 = vld [vmem:[#allocation11 + $0x968] sm:$0xff] }
 0x22e   :  { %2044 = vmatprep.subr.bf16.mxu0 %v2043_v40  ;;  %2172 = vmatprep.subr.bf16.mxu1 %v2171_v32  ;;  %v904_v40 = vld [vmem:[#allocation11 + $0x9a8] sm:$0xff]  ;;  %v2061_v32 = vpack.c.bf16 %v889_v30, %v883_v29  ;;  %v2189_v41 = vpack.c.bf16 %v891_v36, %v885_v35  ;;  %v2063_v43 = vpack.c.bf16 %v902_v38, %v896_v37  ;;  %v950_v29 = vld [vmem:[#allocation11 + $0xb18] sm:$0xff]  ;;  %v943_v36 = vld [vmem:[#allocation11 + $0xae0] sm:$0xff] }
 0x22f   :  { %v2191_v44 = vpack.c.bf16 %v904_v40, %v898_v39  ;;  %v946_v30 = vld [vmem:[#allocation11 + $0xaf8] sm:$0xff]  ;;  %v949_v37 = vld [vmem:[#allocation11 + $0xb10] sm:$0xff] }
 0x230   :  { %v945_v40 = vld [vmem:[#allocation11 + $0xaf0] sm:$0xff] }
 0x231   :  { %2046 = vmatpush1.bf16.msra.mxu0 %v2045_v47  ;;  %2174 = vmatpush1.bf16.msra.mxu1 %v2173_v48  ;;  %v903_v47 = vld [vmem:[#allocation11 + $0x9a0] sm:$0xff]  ;;  %v908_v48 = vld [vmem:[#allocation11 + $0x9c8] sm:$0xff] }
 0x232   :  { %2048 = vmatprep.subr.bf16.mxu0 %v2047_v51  ;;  %2176 = vmatprep.subr.bf16.mxu1 %v2175_v52  ;;  %v916_v51 = vld [vmem:[#allocation11 + $0xa08] sm:$0xff]  ;;  %v2065_v52 = vpack.c.bf16 %v901_v42, %v895_v31  ;;  %v2193_v54 = vpack.c.bf16 %v903_v47, %v897_v45  ;;  %v2067_v57 = vpack.c.bf16 %v914_v49, %v908_v48  ;;  %v962_v31 = vld [vmem:[#allocation11 + $0xb78] sm:$0xff]  ;;  %v955_v47 = vld [vmem:[#allocation11 + $0xb40] sm:$0xff] }
 0x233   :  { %v2195_v58 = vpack.c.bf16 %v916_v51, %v910_v50  ;;  %v958_v42 = vld [vmem:[#allocation11 + $0xb58] sm:$0xff]  ;;  %v961_v48 = vld [vmem:[#allocation11 + $0xb70] sm:$0xff] }
 0x234   :  { %v957_v51 = vld [vmem:[#allocation11 + $0xb50] sm:$0xff] }
 0x235   :  { %2050 = vmatpush1.bf16.msra.mxu0 %v2049_v60  ;;  %2178 = vmatpush1.bf16.msra.mxu1 %v2177_v61  ;;  %v915_v60 = vld [vmem:[#allocation11 + $0xa00] sm:$0xff]  ;;  %v920_v61 = vld [vmem:[#allocation11 + $0xa28] sm:$0xff] }
 0x236   :  { %2052 = vmatprep.subr.bf16.mxu0 %v2051_v6  ;;  %2180 = vmatprep.subr.bf16.mxu1 %v2179_v7  ;;  %v928_v6 = vld [vmem:[#allocation11 + $0xa68] sm:$0xff]  ;;  %v2069_v7 = vpack.c.bf16 %v913_v56, %v907_v55  ;;  %v2197_v8 = vpack.c.bf16 %v915_v60, %v909_v59  ;;  %v2071_v11 = vpack.c.bf16 %v926_v63, %v920_v61  ;;  %v974_v55 = vld [vmem:[#allocation11 + $0xbd8] sm:$0xff]  ;;  %v967_v60 = vld [vmem:[#allocation11 + $0xba0] sm:$0xff] }
 0x237   :  { %v2199_v0 = vpack.c.bf16 %v928_v6, %v922_v5  ;;  %v970_v56 = vld [vmem:[#allocation11 + $0xbb8] sm:$0xff]  ;;  %v973_v5 = vld [vmem:[#allocation11 + $0xbd0] sm:$0xff] }
 0x238   :  { %v969_v6 = vld [vmem:[#allocation11 + $0xbb0] sm:$0xff] }
 0x239   :  { %2054 = vmatpush1.bf16.msra.mxu0 %v2053_v14  ;;  %2182 = vmatpush1.bf16.msra.mxu1 %v2181_v15  ;;  %v927_v14 = vld [vmem:[#allocation11 + $0xa60] sm:$0xff]  ;;  %v932_v15 = vld [vmem:[#allocation11 + $0xa88] sm:$0xff] }
 0x23a   :  { %2056 = vmatprep.subr.bf16.mxu0 %v2055_v18  ;;  %2184 = vmatprep.subr.bf16.mxu1 %v2183_v19  ;;  %v940_v18 = vld [vmem:[#allocation11 + $0xac8] sm:$0xff]  ;;  %v2073_v19 = vpack.c.bf16 %v925_v10, %v919_v9  ;;  %v2201_v20 = vpack.c.bf16 %v927_v14, %v921_v12  ;;  %v2075_v23 = vpack.c.bf16 %v938_v16, %v932_v15  ;;  %v606_v9 = vld [vmem:[#allocation11 + $0x58] sm:$0xff]  ;;  %v599_v12 = vld [vmem:[#allocation11 + $0x20] sm:$0xff] }
 0x23b   :  { %v2203_v24 = vpack.c.bf16 %v940_v18, %v934_v17  ;;  %v2089_v10 = vpack.c.bf16 %v973_v5, %v967_v60  ;;  %v605_v14 = vld [vmem:[#allocation11 + $0x50] sm:$0xff]  ;;  %v612_v15 = vld [vmem:[#allocation11 + $0x88] sm:$0xff]  ;;  %v618_v16 = vld [vmem:[#allocation11 + $0xb8] sm:$0xff]  ;;  %v2964_v18 = vmax.f32 %v2953_v62, 0.0 }
 0x23c   :  { %v2221_v17 = vpack.c.bf16 %v605_v14, %v599_v12  ;;  %v1504_v62 = vld [vmem:[%s3309_s8 + $0x88] sm:$0xff]  ;;  %v1493_v60 = vld [vmem:[%s3309_s8 + $0x30] sm:$0xff]  ;;  %v1495_v14 = vld [vmem:[%s3309_s8 + $0x40] sm:$0xff] }
 0x23d   :  { %2058 = vmatpush1.bf16.msra.mxu0 %v2057_v27  ;;  %2186 = vmatpush1.bf16.msra.mxu1 %v2185_v28  ;;  %v939_v27 = vld [vmem:[#allocation11 + $0xac0] sm:$0xff]  ;;  %v944_v28 = vld [vmem:[#allocation11 + $0xae8] sm:$0xff]  ;;  %v653_v5 = vld [vmem:[#allocation11 + $0x1d0] sm:$0xff] }
 0x23e   :  { %2060 = vmatprep.subr.bf16.mxu0 %v2059_v33  ;;  %2188 = vmatprep.subr.bf16.mxu1 %v2187_v34  ;;  %v952_v33 = vld [vmem:[#allocation11 + $0xb28] sm:$0xff]  ;;  %v2077_v34 = vpack.c.bf16 %v937_v22, %v931_v21  ;;  %v2205_v35 = vpack.c.bf16 %v939_v27, %v933_v26  ;;  %v2079_v38 = vpack.c.bf16 %v950_v29, %v944_v28  ;;  %v617_v21 = vld [vmem:[#allocation11 + $0xb0] sm:$0xff] }
 0x23f   :  { %v2207_v39 = vpack.c.bf16 %v952_v33, %v946_v30  ;;  %v624_v22 = vld [vmem:[#allocation11 + $0xe8] sm:$0xff]  ;;  %v629_v26 = vld [vmem:[#allocation11 + $0x110] sm:$0xff] }
 0x240   :  { %v1503_v27 = vld [vmem:[%s3309_s8 + $0x80] sm:$0xff]  ;;  %v1488_v33 = vld [vmem:[%s3309_s8 + $0x8] sm:$0xff] }
 0x241   :  { %2062 = vmatpush1.bf16.msra.mxu0 %v2061_v32  ;;  %2190 = vmatpush1.bf16.msra.mxu1 %v2189_v41  ;;  %v951_v32 = vld [vmem:[#allocation11 + $0xb20] sm:$0xff]  ;;  %v956_v41 = vld [vmem:[#allocation11 + $0xb48] sm:$0xff]  ;;  %v2347_v30 = vpack.c.bf16 %v1504_v62, %v1503_v27  ;;  %v1497_v27 = vld [vmem:[%s3309_s8 + $0x50] sm:$0xff] }
 0x242   :  { %2064 = vmatprep.subr.bf16.mxu0 %v2063_v43  ;;  %2192 = vmatprep.subr.bf16.mxu1 %v2191_v44  ;;  %v964_v43 = vld [vmem:[#allocation11 + $0xb88] sm:$0xff]  ;;  %v2081_v44 = vpack.c.bf16 %v949_v37, %v943_v36  ;;  %v2209_v45 = vpack.c.bf16 %v951_v32, %v945_v40  ;;  %v2083_v49 = vpack.c.bf16 %v962_v31, %v956_v41  ;;  %v642_v41 = vld [vmem:[#allocation11 + $0x178] sm:$0xff]  ;;  %v1508_v31 = vld [vmem:[%s3309_s8 + $0xa8] sm:$0xff] }
 0x243   :  { %v2211_v50 = vpack.c.bf16 %v964_v43, %v958_v42  ;;  %v1487_v28 = vld [vmem:[%s3309_s8] sm:$0xff]  ;;  %v1498_v62 = vld [vmem:[%s3309_s8 + $0x58] sm:$0xff] }
 0x244   :  { %v2349_v37 = vpack.c.bf16 %v1488_v33, %v1487_v28  ;;  %v1507_v40 = vld [vmem:[%s3309_s8 + $0xa0] sm:$0xff] }
 0x245   :  { %2066 = vmatpush1.bf16.msra.mxu0 %v2065_v52  ;;  %2194 = vmatpush1.bf16.msra.mxu1 %v2193_v54  ;;  %v963_v52 = vld [vmem:[#allocation11 + $0xb80] sm:$0xff]  ;;  %v968_v54 = vld [vmem:[#allocation11 + $0xba8] sm:$0xff] }
 0x246   :  { %2068 = vmatprep.subr.bf16.mxu0 %v2067_v57  ;;  %2196 = vmatprep.subr.bf16.mxu1 %v2195_v58  ;;  %v976_v57 = vld [vmem:[#allocation11 + $0xbe8] sm:$0xff]  ;;  %v2085_v58 = vpack.c.bf16 %v961_v48, %v955_v47  ;;  %v2213_v59 = vpack.c.bf16 %v963_v52, %v957_v51  ;;  %v2087_v61 = vpack.c.bf16 %v974_v55, %v968_v54  ;;  %v1492_v48 = vld [vmem:[%s3309_s8 + $0x28] sm:$0xff]  ;;  %v1509_v51 = vld [vmem:[%s3309_s8 + $0xb0] sm:$0xff] }
 0x247   :  { %v2215_v63 = vpack.c.bf16 %v976_v57, %v970_v56  ;;  %v636_v32 = vld [vmem:[#allocation11 + $0x148] sm:$0xff]  ;;  %v1510_v52 = vld [vmem:[%s3309_s8 + $0xb8] sm:$0xff]  ;;  %v654_v55 = vld [vmem:[#allocation11 + $0x1d8] sm:$0xff] }
 0x248   :  { %v1491_v47 = vld [vmem:[%s3309_s8 + $0x20] sm:$0xff] }
 0x249   :  { %2070 = vmatpush1.bf16.msra.mxu0 %v2069_v7  ;;  %2198 = vmatpush1.bf16.msra.mxu1 %v2197_v8  ;;  %v975_v7 = vld [vmem:[#allocation11 + $0xbe0] sm:$0xff]  ;;  %v600_v8 = vld [vmem:[#allocation11 + $0x28] sm:$0xff]  ;;  %v2357_v56 = vpack.c.bf16 %v1492_v48, %v1491_v47 }
 0x24a   :  { %2072 = vmatprep.subr.bf16.mxu0 %v2071_v11  ;;  %2200 = vmatprep.subr.bf16.mxu1 %v2199_v0  ;;  %v2217_v11 = vpack.c.bf16 %v975_v7, %v969_v6  ;;  %v2219_v0 = vpack.c.bf16 %v606_v9, %v600_v8  ;;  %v648_v54 = vld [vmem:[#allocation11 + $0x1a8] sm:$0xff]  ;;  %v1512_v7 = vld [vmem:[%s3309_s8 + $0xc8] sm:$0xff]  ;;  %v666_v9 = vld [vmem:[#allocation11 + $0x238] sm:$0xff] }
 0x24b   :  { %v1511_v6 = vld [vmem:[%s3309_s8 + $0xc0] sm:$0xff]  ;;  %v707_v48 = vld [vmem:[#allocation11 + $0x380] sm:$0xff] }
 0x24c   :  { %v660_v8 = vld [vmem:[#allocation11 + $0x208] sm:$0xff]  ;;  %v2363_v12 = vpack.c.bf16 %v1512_v7, %v1511_v6  ;;  %v750_v6 = vld [vmem:[#allocation11 + $0x4d8] sm:$0xff] }
 0x24d   :  { %2074 = vmatpush1.bf16.msra.mxu0 %v2073_v19  ;;  %2202 = vmatpush1.bf16.msra.mxu1 %v2201_v20  ;;  %v2223_v19 = vpack.c.bf16 %v618_v16, %v612_v15  ;;  %v611_v20 = vld [vmem:[#allocation11 + $0x80] sm:$0xff]  ;;  %v1496_v15 = vld [vmem:[%s3309_s8 + $0x48] sm:$0xff]  ;;  %v2239_v16 = vpack.c.bf16 %v666_v9, %v660_v8  ;;  %v684_v33 = vld [vmem:[#allocation11 + $0x2c8] sm:$0xff] }
 0x24e   :  { %2076 = vmatprep.subr.bf16.mxu0 %v2075_v23  ;;  %2204 = vmatprep.subr.bf16.mxu1 %v2203_v24  ;;  %v630_v23 = vld [vmem:[#allocation11 + $0x118] sm:$0xff]  ;;  %v623_v24 = vld [vmem:[#allocation11 + $0xe0] sm:$0xff]  ;;  %v2225_v29 = vpack.c.bf16 %v617_v21, %v611_v20  ;;  %v672_v21 = vld [vmem:[#allocation11 + $0x268] sm:$0xff] }
 0x24f   :  { %v2227_v36 = vpack.c.bf16 %v630_v23, %v624_v22  ;;  %v2229_v43 = vpack.c.bf16 %v629_v26, %v623_v24  ;;  %v1514_v20 = vld [vmem:[%s3309_s8 + $0xd8] sm:$0xff]  ;;  %v678_v22 = vld [vmem:[#allocation11 + $0x298] sm:$0xff]  ;;  %v2365_v23 = vpack.c.bf16 %v1496_v15, %v1495_v14 }
 0x250   :  { %v2243_v28 = vpack.c.bf16 %v678_v22, %v672_v21  ;;  %v743_v9 = vld [vmem:[#allocation11 + $0x4a0] sm:$0xff] }
 0x251   :  { %2078 = vmatpush1.bf16.msra.mxu0 %v2077_v34  ;;  %2206 = vmatpush1.bf16.msra.mxu1 %v2205_v35  ;;  %v1505_v34 = vld [vmem:[%s3309_s8 + $0x90] sm:$0xff]  ;;  %v1506_v35 = vld [vmem:[%s3309_s8 + $0x98] sm:$0xff] }
 0x252   :  { %2080 = vmatprep.subr.bf16.mxu0 %v2079_v38  ;;  %2208 = vmatprep.subr.bf16.mxu1 %v2207_v39  ;;  %v2351_v38 = vpack.c.bf16 %v1506_v35, %v1505_v34  ;;  %v1490_v39 = vld [vmem:[%s3309_s8 + $0x18] sm:$0xff]  ;;  %v690_v34 = vld [vmem:[#allocation11 + $0x2f8] sm:$0xff]  ;;  %v2369_v35 = vpack.c.bf16 %v1498_v62, %v1497_v27 }
 0x253   :  { %v755_v15 = vld [vmem:[#allocation11 + $0x500] sm:$0xff] }
 0x254   :  { %v767_v22 = vld [vmem:[#allocation11 + $0x560] sm:$0xff] }
 0x255   :  { %2082 = vmatpush1.bf16.msra.mxu0 %v2081_v44  ;;  %2210 = vmatpush1.bf16.msra.mxu1 %v2209_v45  ;;  %v635_v44 = vld [vmem:[#allocation11 + $0x140] sm:$0xff]  ;;  %v2355_v45 = vpack.c.bf16 %v1508_v31, %v1507_v40  ;;  %v702_v40 = vld [vmem:[#allocation11 + $0x358] sm:$0xff] }
 0x256   :  { %2084 = vmatprep.subr.bf16.mxu0 %v2083_v49  ;;  %2212 = vmatprep.subr.bf16.mxu1 %v2211_v50  ;;  %v2231_v49 = vpack.c.bf16 %v642_v41, %v636_v32  ;;  %v641_v50 = vld [vmem:[#allocation11 + $0x170] sm:$0xff]  ;;  %v695_v31 = vld [vmem:[#allocation11 + $0x320] sm:$0xff] }
 0x257   :  { %v2233_v57 = vpack.c.bf16 %v641_v50, %v635_v44  ;;  %v714_v44 = vld [vmem:[#allocation11 + $0x3b8] sm:$0xff]  ;;  %v720_v50 = vld [vmem:[#allocation11 + $0x3e8] sm:$0xff] }
 0x259   :  { %2086 = vmatpush1.bf16.msra.mxu0 %v2085_v58  ;;  %2214 = vmatpush1.bf16.msra.mxu1 %v2213_v59  ;;  %v647_v58 = vld [vmem:[#allocation11 + $0x1a0] sm:$0xff]  ;;  %v2359_v59 = vpack.c.bf16 %v1510_v52, %v1509_v51  ;;  %v726_v51 = vld [vmem:[#allocation11 + $0x418] sm:$0xff] }
 0x25a   :  { %2088 = vmatprep.subr.bf16.mxu0 %v2087_v61  ;;  %2216 = vmatprep.subr.bf16.mxu1 %v2215_v63  ;;  %v1494_v61 = vld [vmem:[%s3309_s8 + $0x38] sm:$0xff]  ;;  %v2235_v63 = vpack.c.bf16 %v654_v55, %v648_v54  ;;  %v2259_v54 = vpack.c.bf16 %v726_v51, %v720_v50 }
 0x25b   :  { %v719_v55 = vld [vmem:[#allocation11 + $0x3e0] sm:$0xff] }
 0x25d   :  { %2090 = vmatpush1.bf16.msra.mxu0 %v2089_v10  ;;  %2218 = vmatpush1.bf16.msra.mxu1 %v2217_v11  ;;  %v2361_v10 = vpack.c.bf16 %v1494_v61, %v1493_v60  ;;  %v2237_v11 = vpack.c.bf16 %v653_v5, %v647_v58  ;;  %v738_v58 = vld [vmem:[#allocation11 + $0x478] sm:$0xff]  ;;  %v731_v61 = vld [vmem:[#allocation11 + $0x440] sm:$0xff]  ;;  %v744_v5 = vld [vmem:[#allocation11 + $0x4a8] sm:$0xff] }
 0x25e   :  { %2220 = vmatprep.subr.bf16.mxu0 %v2219_v0  ;;  %2348 = vmatprep.subr.bf16.mxu1 %v2347_v30  ;;  %v659_v0 = vld [vmem:[#allocation11 + $0x200] sm:$0xff]  ;;  %v677_v30 = vld [vmem:[#allocation11 + $0x290] sm:$0xff]  ;;  %v2267_v8 = vpack.c.bf16 %v750_v6, %v744_v5 }
 0x25f   :  { %v851_v5 = vld [vmem:[#allocation11 + $0x800] sm:$0xff]  ;;  %v857_v6 = vld [vmem:[#allocation11 + $0x830] sm:$0xff] }
 0x260   :  { %1115 = vmatmul.mubr.f32.vlgmr.msra.gmra.mrb[0].mxu0 %v2964_v18  ;;  %1257 = vmatmul.mubr.f32.vlgmr.msra.gmra.mrb[8].mxu1 %v2964_v18 }
 0x261   :  { %2222 = vmatpush1.bf16.msra.mxu0 %v2221_v17  ;;  %1327 = vmatprep.mubr.f32.mxu0 %v2946_v46  ;;  %v1489_v46 = vld [vmem:[%s3309_s8 + $0x10] sm:$0xff]  ;;  %v665_v17 = vld [vmem:[#allocation11 + $0x230] sm:$0xff] }
 0x262   :  { %2224 = vmatprep.subr.bf16.mxu0 %v2223_v19  ;;  %2350 = vmatpush3.bf16.msra.mxu1 %v2349_v37  ;;  %v2353_v42 = vpack.c.bf16 %v1490_v39, %v1489_v46  ;;  %v1513_v19 = vld [vmem:[%s3309_s8 + $0xd0] sm:$0xff]  ;;  %v2241_v24 = vpack.c.bf16 %v665_v17, %v659_v0  ;;  %v2247_v37 = vpack.c.bf16 %v690_v34, %v684_v33  ;;  %v689_v46 = vld [vmem:[#allocation11 + $0x2f0] sm:$0xff]  ;;  %v696_v39 = vld [vmem:[#allocation11 + $0x328] sm:$0xff] }
 0x263   :  { %2352 = vmatprep.subr.bf16.mxu1 %v2351_v38  ;;  %v2367_v26 = vpack.c.bf16 %v1514_v20, %v1513_v19  ;;  %v683_v38 = vld [vmem:[#allocation11 + $0x2c0] sm:$0xff]  ;;  %v2251_v41 = vpack.c.bf16 %v702_v40, %v696_v39  ;;  %v762_v0 = vld [vmem:[#allocation11 + $0x538] sm:$0xff]  ;;  %v768_v17 = vld [vmem:[#allocation11 + $0x568] sm:$0xff] }
 0x264   :  { %v2249_v32 = vpack.c.bf16 %v689_v46, %v683_v38  ;;  %v774_v19 = vld [vmem:[#allocation11 + $0x598] sm:$0xff]  ;;  %v804_v38 = vld [vmem:[#allocation11 + $0x688] sm:$0xff] }
 0x265   :  { %2226 = vmatpush1.bf16.msra.mxu0 %v2225_v29  ;;  %v671_v29 = vld [vmem:[#allocation11 + $0x260] sm:$0xff]  ;;  %v2275_v21 = vpack.c.bf16 %v774_v19, %v768_v17  ;;  %v798_v33 = vld [vmem:[#allocation11 + $0x658] sm:$0xff]  ;;  %v869_v17 = vld [vmem:[#allocation11 + $0x890] sm:$0xff] }
 0x266   :  { %2228 = vmatprep.subr.bf16.mxu0 %v2227_v36  ;;  %2354 = vmatpush3.bf16.msra.mxu1 %v2353_v42  ;;  %v2245_v36 = vpack.c.bf16 %v677_v30, %v671_v29  ;;  %v701_v42 = vld [vmem:[#allocation11 + $0x350] sm:$0xff]  ;;  %v792_v30 = vld [vmem:[#allocation11 + $0x628] sm:$0xff]  ;;  %v810_v46 = vld [vmem:[#allocation11 + $0x6b8] sm:$0xff] }
 0x267   :  { %2356 = vmatprep.subr.bf16.mxu1 %v2355_v45  ;;  %v2253_v45 = vpack.c.bf16 %v701_v42, %v695_v31  ;;  %v785_v29 = vld [vmem:[#allocation11 + $0x5f0] sm:$0xff]  ;;  %v2287_v40 = vpack.c.bf16 %v810_v46, %v804_v38  ;;  %v816_v31 = vld [vmem:[#allocation11 + $0x6e8] sm:$0xff]  ;;  %v822_v42 = vld [vmem:[#allocation11 + $0x718] sm:$0xff] }
 0x269   :  { %2230 = vmatpush1.bf16.msra.mxu0 %v2229_v43  ;;  %v708_v43 = vld [vmem:[#allocation11 + $0x388] sm:$0xff] }
 0x26a   :  { %2232 = vmatprep.subr.bf16.mxu0 %v2231_v49  ;;  %2358 = vmatpush3.bf16.msra.mxu1 %v2357_v56  ;;  %v2255_v47 = vpack.c.bf16 %v714_v44, %v708_v43  ;;  %v713_v49 = vld [vmem:[#allocation11 + $0x3b0] sm:$0xff]  ;;  %v2291_v44 = vpack.c.bf16 %v822_v42, %v816_v31  ;;  %v906_v31 = vld [vmem:[#allocation11 + $0x9b8] sm:$0xff] }
 0x26b   :  { %2360 = vmatprep.subr.bf16.mxu1 %v2359_v59  ;;  %v2257_v52 = vpack.c.bf16 %v713_v49, %v707_v48  ;;  %v725_v56 = vld [vmem:[#allocation11 + $0x410] sm:$0xff]  ;;  %v828_v48 = vld [vmem:[#allocation11 + $0x748] sm:$0xff]  ;;  %v834_v49 = vld [vmem:[#allocation11 + $0x778] sm:$0xff] }
 0x26c   :  { %v2261_v59 = vpack.c.bf16 %v725_v56, %v719_v55  ;;  %v2295_v51 = vpack.c.bf16 %v834_v49, %v828_v48  ;;  %v840_v55 = vld [vmem:[#allocation11 + $0x7a8] sm:$0xff]  ;;  %v846_v56 = vld [vmem:[#allocation11 + $0x7d8] sm:$0xff] }
 0x26d   :  { %2234 = vmatpush1.bf16.msra.mxu0 %v2233_v57  ;;  %v732_v57 = vld [vmem:[#allocation11 + $0x448] sm:$0xff]  ;;  %v918_v48 = vld [vmem:[#allocation11 + $0xa18] sm:$0xff] }
 0x26e   :  { %2236 = vmatprep.subr.bf16.mxu0 %v2235_v63  ;;  %2362 = vmatpush3.bf16.msra.mxu1 %v2361_v10  ;;  %v2263_v60 = vpack.c.bf16 %v738_v58, %v732_v57  ;;  %v737_v63 = vld [vmem:[#allocation11 + $0x470] sm:$0xff]  ;;  %v2299_v57 = vpack.c.bf16 %v846_v56, %v840_v55  ;;  %v930_v55 = vld [vmem:[#allocation11 + $0xa78] sm:$0xff] }
 0x26f   :  { %2364 = vmatprep.subr.bf16.mxu1 %v2363_v12  ;;  %v2265_v7 = vpack.c.bf16 %v737_v63, %v731_v61  ;;  %v749_v10 = vld [vmem:[#allocation11 + $0x4d0] sm:$0xff] }
 0x270   :  { %v2269_v12 = vpack.c.bf16 %v749_v10, %v743_v9  ;;  %v845_v58 = vld [vmem:[#allocation11 + $0x7d0] sm:$0xff]  ;;  %v1515_v9 = vld [vmem:[%s3309_s8 + $0xe0] sm:$0xff] }
 0x271   :  { %2238 = vmatpush1.bf16.msra.mxu0 %v2237_v11  ;;  %v756_v11 = vld [vmem:[#allocation11 + $0x508] sm:$0xff]  ;;  %v1516_v10 = vld [vmem:[%s3309_s8 + $0xe8] sm:$0xff] }
 0x272   :  { %2240 = vmatprep.subr.bf16.mxu0 %v2239_v16  ;;  %2366 = vmatpush3.bf16.msra.mxu1 %v2365_v23  ;;  %v2271_v14 = vpack.c.bf16 %v762_v0, %v756_v11  ;;  %v761_v16 = vld [vmem:[#allocation11 + $0x530] sm:$0xff]  ;;  %v2305_v11 = vpack.c.bf16 %v857_v6, %v851_v5  ;;  %v2371_v0 = vpack.c.bf16 %v1516_v10, %v1515_v9  ;;  %v948_v6 = vld [vmem:[#allocation11 + $0xb08] sm:$0xff]  ;;  %v947_v10 = vld [vmem:[#allocation11 + $0xb00] sm:$0xff] }
 0x273   :  { %2368 = vmatprep.subr.bf16.mxu1 %v2367_v26  ;;  %v2273_v20 = vpack.c.bf16 %v761_v16, %v755_v15  ;;  %v773_v23 = vld [vmem:[#allocation11 + $0x590] sm:$0xff]  ;;  %v786_v26 = vld [vmem:[#allocation11 + $0x5f8] sm:$0xff]  ;;  %v863_v16 = vld [vmem:[#allocation11 + $0x860] sm:$0xff] }
 0x274   :  { %v2277_v27 = vpack.c.bf16 %v773_v23, %v767_v22  ;;  %v1517_v22 = vld [vmem:[%s3309_s8 + $0xf0] sm:$0xff]  ;;  %v1518_v23 = vld [vmem:[%s3309_s8 + $0xf8] sm:$0xff]  ;;  %v941_v5 = vld [vmem:[#allocation11 + $0xad0] sm:$0xff] }
 0x275   :  { %2242 = vmatpush1.bf16.msra.mxu0 %v2241_v24  ;;  %v780_v24 = vld [vmem:[#allocation11 + $0x5c8] sm:$0xff] }
 0x276   :  { %2244 = vmatprep.subr.bf16.mxu0 %v2243_v28  ;;  %2370 = vmatpush3.bf16.msra.mxu1 %v2369_v35  ;;  %v2279_v62 = vpack.c.bf16 %v786_v26, %v780_v24  ;;  %v779_v28 = vld [vmem:[#allocation11 + $0x5c0] sm:$0xff]  ;;  %v2283_v35 = vpack.c.bf16 %v798_v33, %v792_v30  ;;  %v2309_v24 = vpack.c.bf16 %v869_v17, %v863_v16  ;;  %v881_v30 = vld [vmem:[#allocation11 + $0x8f0] sm:$0xff] }
 0x277   :  { %v2281_v34 = vpack.c.bf16 %v785_v29, %v779_v28  ;;  %2372 = vmatprep.subr.bf16.mxu1 %v2371_v0  ;;  %v2375_v26 = vpack.c.bf16 %v1518_v23, %v1517_v22  ;;  %v875_v29 = vld [vmem:[#allocation11 + $0x8c0] sm:$0xff]  ;;  %v960_v0 = vld [vmem:[#allocation11 + $0xb68] sm:$0xff]  ;;  %v965_v17 = vld [vmem:[#allocation11 + $0xb90] sm:$0xff] }
 0x278   :  { %v2313_v38 = vpack.c.bf16 %v881_v30, %v875_v29  ;;  %v959_v16 = vld [vmem:[#allocation11 + $0xb60] sm:$0xff] }
 0x279   :  { %2246 = vmatpush1.bf16.msra.mxu0 %v2245_v36  ;;  %v791_v36 = vld [vmem:[#allocation11 + $0x620] sm:$0xff] }
 0x27a   :  { %2248 = vmatprep.subr.bf16.mxu0 %v2247_v37  ;;  %v797_v37 = vld [vmem:[#allocation11 + $0x650] sm:$0xff]  ;;  %v971_v23 = vld [vmem:[#allocation11 + $0xbc0] sm:$0xff] }
 0x27b   :  { %v2285_v39 = vpack.c.bf16 %v797_v37, %v791_v36  ;;  %v1535_v36 = vld [vmem:[%s3309_s8 + $0x180] sm:$0xff]  ;;  %v1536_v37 = vld [vmem:[%s3309_s8 + $0x188] sm:$0xff] }
 0x27c   :  { %v2379_v46 = vpack.c.bf16 %v1536_v37, %v1535_v36 }
 0x27d   :  { %2250 = vmatpush1.bf16.msra.mxu0 %v2249_v32  ;;  %v803_v32 = vld [vmem:[#allocation11 + $0x680] sm:$0xff] }
 0x27e   :  { %2252 = vmatprep.subr.bf16.mxu0 %v2251_v41  ;;  %v809_v41 = vld [vmem:[#allocation11 + $0x6b0] sm:$0xff] }
 0x27f   :  { %v2289_v43 = vpack.c.bf16 %v809_v41, %v803_v32  ;;  %v893_v32 = vld [vmem:[#allocation11 + $0x950] sm:$0xff]  ;;  %v900_v41 = vld [vmem:[#allocation11 + $0x988] sm:$0xff] }
 0x281   :  { %2254 = vmatpush1.bf16.msra.mxu0 %v2253_v45  ;;  %v815_v45 = vld [vmem:[#allocation11 + $0x6e0] sm:$0xff] }
 0x282   :  { %2256 = vmatprep.subr.bf16.mxu0 %v2255_v47  ;;  %v821_v47 = vld [vmem:[#allocation11 + $0x710] sm:$0xff] }
 0x283   :  { %v2293_v50 = vpack.c.bf16 %v821_v47, %v815_v45  ;;  %v905_v45 = vld [vmem:[#allocation11 + $0x9b0] sm:$0xff]  ;;  %v912_v47 = vld [vmem:[#allocation11 + $0x9e8] sm:$0xff] }
 0x285   :  { %2258 = vmatpush1.bf16.msra.mxu0 %v2257_v52  ;;  %v827_v52 = vld [vmem:[#allocation11 + $0x740] sm:$0xff] }
 0x286   :  { %2260 = vmatprep.subr.bf16.mxu0 %v2259_v54  ;;  %v833_v54 = vld [vmem:[#allocation11 + $0x770] sm:$0xff] }
 0x289   :  { %2262 = vmatpush1.bf16.msra.mxu0 %v2261_v59  ;;  %v852_v59 = vld [vmem:[#allocation11 + $0x808] sm:$0xff] }
 0x28a   :  { %2264 = vmatprep.subr.bf16.mxu0 %v2263_v60  ;;  %v858_v60 = vld [vmem:[#allocation11 + $0x838] sm:$0xff] }
 0x28b   :  { %v2303_v63 = vpack.c.bf16 %v858_v60, %v852_v59  ;;  %v942_v59 = vld [vmem:[#allocation11 + $0xad8] sm:$0xff] }
 0x28d   :  { %2266 = vmatpush1.bf16.msra.mxu0 %v2265_v7  ;;  %v864_v7 = vld [vmem:[#allocation11 + $0x868] sm:$0xff] }
 0x28e   :  { %2268 = vmatprep.subr.bf16.mxu0 %v2267_v8  ;;  %v870_v8 = vld [vmem:[#allocation11 + $0x898] sm:$0xff] }
 0x28f   :  { %v2307_v15 = vpack.c.bf16 %v870_v8, %v864_v7  ;;  %v954_v7 = vld [vmem:[#allocation11 + $0xb38] sm:$0xff] }
 0x290   :  { %v2335_v9 = vpack.c.bf16 %v954_v7, %v948_v6 }
 0x291   :  { %2270 = vmatpush1.bf16.msra.mxu0 %v2269_v12  ;;  %v1499_v12 = vld [vmem:[%s3309_s8 + $0x60] sm:$0xff] }
 0x292   :  { %2272 = vmatprep.subr.bf16.mxu0 %v2271_v14  ;;  %v1500_v14 = vld [vmem:[%s3309_s8 + $0x68] sm:$0xff] }
 0x293   :  { %v2373_v19 = vpack.c.bf16 %v1500_v14, %v1499_v12  ;;  %v966_v12 = vld [vmem:[#allocation11 + $0xb98] sm:$0xff] }
 0x295   :  { %2274 = vmatpush1.bf16.msra.mxu0 %v2273_v20  ;;  %v876_v20 = vld [vmem:[#allocation11 + $0x8c8] sm:$0xff]  ;;  %2374 = vmatpush3.bf16.msra.mxu1 %v2373_v19 }
 0x296   :  { %2276 = vmatprep.subr.bf16.mxu0 %v2275_v21  ;;  %v882_v21 = vld [vmem:[#allocation11 + $0x8f8] sm:$0xff]  ;;  %2376 = vmatprep.subr.bf16.mxu1 %v2375_v26  ;;  %v972_v19 = vld [vmem:[#allocation11 + $0xbc8] sm:$0xff] }
 0x297   :  { %v2311_v28 = vpack.c.bf16 %v882_v21, %v876_v20  ;;  %v978_v20 = vld [vmem:[#allocation11 + $0xbf8] sm:$0xff]  ;;  %v2341_v21 = vpack.c.bf16 %v965_v17, %v959_v16  ;;  %v1547_v16 = vld [vmem:[%s3309_s8 + $0x1e0] sm:$0xff]  ;;  %v1548_v17 = vld [vmem:[%s3309_s8 + $0x1e8] sm:$0xff] }
 0x298   :  { %v2343_v22 = vpack.c.bf16 %v978_v20, %v972_v19 }
 0x299   :  { %2278 = vmatpush1.bf16.msra.mxu0 %v2277_v27  ;;  %v1501_v27 = vld [vmem:[%s3309_s8 + $0x70] sm:$0xff] }
 0x29a   :  { %2280 = vmatprep.subr.bf16.mxu0 %v2279_v62  ;;  %v1502_v62 = vld [vmem:[%s3309_s8 + $0x78] sm:$0xff] }
 0x29b   :  { %v2377_v33 = vpack.c.bf16 %v1502_v62, %v1501_v27  ;;  %v3074_v27 = vld [vmem:[#allocation13] sm:$0x3f]  ;;  %v3076_v62 = vld [vmem:[#allocation14] sm:$0x3f] }
 0x29c   :  { %v1414_v29 = vrot.slane %v3074_v27, %v2880_v2  ;;  %v1422_v30 = vrot.slane %v3074_v27, %v2892_v13  ;;  %v1460_v36 = vrot.slane %v3076_v62, %v2892_v13  ;;  %v1538_v13 = vld [vmem:[%s3309_s8 + $0x198] sm:$0xff]  ;;  %v1418_v20 = vrot.slane %v3074_v27, %v2886_v4 }
 0x29d   :  { %2282 = vmatpush1.bf16.msra.mxu0 %v2281_v34  ;;  %v888_v34 = vld [vmem:[#allocation11 + $0x928] sm:$0xff]  ;;  %2378 = vmatpush3.bf16.msra.mxu1 %v2377_v33  ;;  %v1448_v33 = vrot.slane %v3076_v62, %v2883_v3 }
 0x29e   :  { %2284 = vmatprep.subr.bf16.mxu0 %v2283_v35  ;;  %v894_v35 = vld [vmem:[#allocation11 + $0x958] sm:$0xff]  ;;  %2380 = vmatprep.subr.bf16.mxu1 %v2379_v46 }
 0x2a0   :  { %1328 = vmatmul.mubr.f32.vlgmr.msra.gmra.mrb[2].mxu0 %v2949_v53  ;;  %v2297_v53 = vpack.c.bf16 %v833_v54, %v827_v52  ;;  %v917_v52 = vld [vmem:[#allocation11 + $0xa10] sm:$0xff]  ;;  %v924_v54 = vld [vmem:[#allocation11 + $0xa48] sm:$0xff] }
 0x2a1   :  { %2286 = vmatpush1.bf16.msra.mxu0 %v2285_v39  ;;  %1398 = vmatprep.mubr.f32.mxu0 %v2959_v25  ;;  %v839_v25 = vld [vmem:[#allocation11 + $0x7a0] sm:$0xff]  ;;  %v2315_v39 = vpack.c.bf16 %v894_v35, %v888_v34 }
 0x2a2   :  { %2288 = vmatprep.subr.bf16.mxu0 %v2287_v40  ;;  %v2301_v61 = vpack.c.bf16 %v845_v58, %v839_v25  ;;  %v887_v40 = vld [vmem:[#allocation11 + $0x920] sm:$0xff]  ;;  %v929_v25 = vld [vmem:[#allocation11 + $0xa70] sm:$0xff]  ;;  %v936_v58 = vld [vmem:[#allocation11 + $0xaa8] sm:$0xff] }
 0x2a3   :  { %v2317_v42 = vpack.c.bf16 %v893_v32, %v887_v40 }
 0x2a5   :  { %2290 = vmatpush1.bf16.msra.mxu0 %v2289_v43  ;;  %v2319_v43 = vpack.c.bf16 %v906_v31, %v900_v41  ;;  %v1519_v41 = vld [vmem:[%s3309_s8 + $0x100] sm:$0xff] }
 0x2a6   :  { %2292 = vmatprep.subr.bf16.mxu0 %v2291_v44  ;;  %v899_v44 = vld [vmem:[#allocation11 + $0x980] sm:$0xff] }
 0x2a7   :  { %v2321_v49 = vpack.c.bf16 %v905_v45, %v899_v44 }
 0x2a9   :  { %2294 = vmatpush1.bf16.msra.mxu0 %v2293_v50  ;;  %v2323_v50 = vpack.c.bf16 %v918_v48, %v912_v47  ;;  %v1521_v48 = vld [vmem:[%s3309_s8 + $0x110] sm:$0xff] }
 0x2aa   :  { %2296 = vmatprep.subr.bf16.mxu0 %v2295_v51  ;;  %v911_v51 = vld [vmem:[#allocation11 + $0x9e0] sm:$0xff] }
 0x2ab   :  { %v2325_v56 = vpack.c.bf16 %v917_v52, %v911_v51  ;;  %v1539_v51 = vld [vmem:[%s3309_s8 + $0x1a0] sm:$0xff]  ;;  %v1540_v52 = vld [vmem:[%s3309_s8 + $0x1a8] sm:$0xff] }
 0x2ad   :  { %2298 = vmatpush1.bf16.msra.mxu0 %v2297_v53  ;;  %v2327_v53 = vpack.c.bf16 %v930_v55, %v924_v54  ;;  %v2387_v55 = vpack.c.bf16 %v1540_v52, %v1539_v51 }
 0x2ae   :  { %2300 = vmatprep.subr.bf16.mxu0 %v2299_v57  ;;  %v923_v57 = vld [vmem:[#allocation11 + $0xa40] sm:$0xff] }
 0x2af   :  { %v2329_v60 = vpack.c.bf16 %v929_v25, %v923_v57  ;;  %v1541_v57 = vld [vmem:[%s3309_s8 + $0x1b0] sm:$0xff]  ;;  %v1542_v25 = vld [vmem:[%s3309_s8 + $0x1b8] sm:$0xff] }
 0x2b1   :  { %2302 = vmatpush1.bf16.msra.mxu0 %v2301_v61  ;;  %v2331_v61 = vpack.c.bf16 %v942_v59, %v936_v58  ;;  %v2391_v59 = vpack.c.bf16 %v1542_v25, %v1541_v57 }
 0x2b2   :  { %2304 = vmatprep.subr.bf16.mxu0 %v2303_v63  ;;  %v935_v63 = vld [vmem:[#allocation11 + $0xaa0] sm:$0xff] }
 0x2b3   :  { %v2333_v8 = vpack.c.bf16 %v941_v5, %v935_v63  ;;  %v1543_v63 = vld [vmem:[%s3309_s8 + $0x1c0] sm:$0xff]  ;;  %v1544_v5 = vld [vmem:[%s3309_s8 + $0x1c8] sm:$0xff] }
 0x2b4   :  { %v2395_v7 = vpack.c.bf16 %v1544_v5, %v1543_v63 }
 0x2b5   :  { %2306 = vmatpush1.bf16.msra.mxu0 %v2305_v11  ;;  %v953_v11 = vld [vmem:[#allocation11 + $0xb30] sm:$0xff] }
 0x2b6   :  { %2308 = vmatprep.subr.bf16.mxu0 %v2307_v15  ;;  %v2337_v14 = vpack.c.bf16 %v953_v11, %v947_v10  ;;  %v2339_v15 = vpack.c.bf16 %v966_v12, %v960_v0  ;;  %v1545_v10 = vld [vmem:[%s3309_s8 + $0x1d0] sm:$0xff]  ;;  %v1546_v11 = vld [vmem:[%s3309_s8 + $0x1d8] sm:$0xff] }
 0x2b7   :  { %v2399_v12 = vpack.c.bf16 %v1546_v11, %v1545_v10 }
 0x2b9   :  { %2310 = vmatpush1.bf16.msra.mxu0 %v2309_v24  ;;  %v977_v24 = vld [vmem:[#allocation11 + $0xbf0] sm:$0xff] }
 0x2ba   :  { %2312 = vmatprep.subr.bf16.mxu0 %v2311_v28  ;;  %v2345_v26 = vpack.c.bf16 %v977_v24, %v971_v23  ;;  %v1410_v28 = vrot.slane %v3074_v27, %v2883_v3  ;;  %v1520_v3 = vld [vmem:[%s3309_s8 + $0x108] sm:$0xff]  ;;  %v1549_v24 = vld [vmem:[%s3309_s8 + $0x1f0] sm:$0xff] }
 0x2bb   :  { %v2381_v44 = vpack.c.bf16 %v1520_v3, %v1519_v41  ;;  %v1532_v23 = vld [vmem:[%s3309_s8 + $0x168] sm:$0xff] }
 0x2bd   :  { %2314 = vmatpush1.bf16.msra.mxu0 %v2313_v38 }
 0x2be   :  { %2316 = vmatprep.subr.bf16.mxu0 %v2315_v39 }
 0x2c1   :  { %2318 = vmatpush1.bf16.msra.mxu0 %v2317_v42 }
 0x2c2   :  { %2320 = vmatprep.subr.bf16.mxu0 %v2319_v43 }
 0x2c5   :  { %2322 = vmatpush1.bf16.msra.mxu0 %v2321_v49  ;;  %v1522_v49 = vld [vmem:[%s3309_s8 + $0x118] sm:$0xff] }
 0x2c6   :  { %2324 = vmatprep.subr.bf16.mxu0 %v2323_v50  ;;  %v2385_v54 = vpack.c.bf16 %v1522_v49, %v1521_v48  ;;  %v1556_v48 = vld [vmem:[%s3309_s8 + $0x228] sm:$0xff]  ;;  %v1573_v49 = vld [vmem:[%s3309_s8 + $0x2b0] sm:$0xff] }
 0x2c9   :  { %2326 = vmatpush1.bf16.msra.mxu0 %v2325_v56  ;;  %v1523_v56 = vld [vmem:[%s3309_s8 + $0x120] sm:$0xff] }
 0x2ca   :  { %2328 = vmatprep.subr.bf16.mxu0 %v2327_v53  ;;  %v1524_v53 = vld [vmem:[%s3309_s8 + $0x128] sm:$0xff] }
 0x2cb   :  { %v2389_v58 = vpack.c.bf16 %v1524_v53, %v1523_v56  ;;  %v1575_v56 = vld [vmem:[%s3309_s8 + $0x2c0] sm:$0xff]  ;;  %v1576_v53 = vld [vmem:[%s3309_s8 + $0x2c8] sm:$0xff] }
 0x2cc   :  { %v2427_v25 = vpack.c.bf16 %v1576_v53, %v1575_v56 }
 0x2cd   :  { %2330 = vmatpush1.bf16.msra.mxu0 %v2329_v60  ;;  %v1525_v60 = vld [vmem:[%s3309_s8 + $0x130] sm:$0xff] }
 0x2ce   :  { %2332 = vmatprep.subr.bf16.mxu0 %v2331_v61  ;;  %v1526_v61 = vld [vmem:[%s3309_s8 + $0x138] sm:$0xff] }
 0x2cf   :  { %v2393_v6 = vpack.c.bf16 %v1526_v61, %v1525_v60  ;;  %v1577_v60 = vld [vmem:[%s3309_s8 + $0x2d0] sm:$0xff]  ;;  %v1578_v61 = vld [vmem:[%s3309_s8 + $0x2d8] sm:$0xff] }
 0x2d0   :  { %v2431_v5 = vpack.c.bf16 %v1578_v61, %v1577_v60 }
 0x2d1   :  { %2334 = vmatpush1.bf16.msra.mxu0 %v2333_v8  ;;  %v1527_v8 = vld [vmem:[%s3309_s8 + $0x140] sm:$0xff] }
 0x2d2   :  { %2336 = vmatprep.subr.bf16.mxu0 %v2335_v9  ;;  %v1528_v9 = vld [vmem:[%s3309_s8 + $0x148] sm:$0xff] }
 0x2d3   :  { %v2397_v0 = vpack.c.bf16 %v1528_v9, %v1527_v8  ;;  %v1579_v8 = vld [vmem:[%s3309_s8 + $0x2e0] sm:$0xff]  ;;  %v1580_v9 = vld [vmem:[%s3309_s8 + $0x2e8] sm:$0xff] }
 0x2d4   :  { %v2435_v11 = vpack.c.bf16 %v1580_v9, %v1579_v8 }
 0x2d5   :  { %2338 = vmatpush1.bf16.msra.mxu0 %v2337_v14  ;;  %v1529_v14 = vld [vmem:[%s3309_s8 + $0x150] sm:$0xff] }
 0x2d6   :  { %2340 = vmatprep.subr.bf16.mxu0 %v2339_v15  ;;  %v1530_v15 = vld [vmem:[%s3309_s8 + $0x158] sm:$0xff] }
 0x2d7   :  { %v2401_v19 = vpack.c.bf16 %v1530_v15, %v1529_v14  ;;  %v1581_v14 = vld [vmem:[%s3309_s8 + $0x2f0] sm:$0xff]  ;;  %v1582_v15 = vld [vmem:[%s3309_s8 + $0x2f8] sm:$0xff] }
 0x2d9   :  { %2342 = vmatpush1.bf16.msra.mxu0 %v2341_v21  ;;  %v2403_v21 = vpack.c.bf16 %v1548_v17, %v1547_v16  ;;  %v2439_v17 = vpack.c.bf16 %v1582_v15, %v1581_v14 }
 0x2da   :  { %2344 = vmatprep.subr.bf16.mxu0 %v2343_v22  ;;  %v1531_v22 = vld [vmem:[%s3309_s8 + $0x160] sm:$0xff] }
 0x2dd   :  { %2346 = vmatpush1.bf16.msra.mxu0 %v2345_v26  ;;  %v1550_v26 = vld [vmem:[%s3309_s8 + $0x1f8] sm:$0xff] }
 0x2e0   :  { %1399 = vmatmul.mubr.f32.vlgmr.msra.gmra.mrb[2].mxu0 %v2964_v18  ;;  %v1452_v18 = vrot.slane %v3076_v62, %v2880_v2  ;;  %v1537_v2 = vld [vmem:[%s3309_s8 + $0x190] sm:$0xff] }
 0x2e1   :  { %v2383_v47 = vpack.c.bf16 %v1538_v13, %v1537_v2  ;;  %v1554_v2 = vld [vmem:[%s3309_s8 + $0x218] sm:$0xff]  ;;  %v1571_v13 = vld [vmem:[%s3309_s8 + $0x2a0] sm:$0xff] }
 0x333   :  { %v1116_v34 = vpop.f32.mrb[0].mxu0  ;;  %v3086_v35 = vpop.f32.mrb[8].mxu1 }
 0x334   :  { %v1437_v37 = vmul.f32 %v1410_v28, %v1116_v34  ;;  %v1118_v38 = vpop.f32.mrb[1].mxu0  ;;  %v1260_v46 = vpop.f32.mrb[9].mxu1  ;;  %v2405_v28 = vpack.c.bf16 %v1532_v23, %v1531_v22  ;;  %v1533_v34 = vld [vmem:[%s3309_s8 + $0x170] sm:$0xff]  ;;  %v1425_v22 = vsub.s32 4, %v2877_v1  ;;  %v1429_v23 = vsub.s32 5, %v2877_v1 }
 0x335   :  { %v1438_v39 = vmul.f32 %v1414_v29, %v1118_v38  ;;  %v1440_v40 = vmul.f32 %v1422_v30, %v1260_v46  ;;  %v1439_v29 = vmul.f32 %v1418_v20, %v3086_v35  ;;  %v1456_v30 = vrot.slane %v3076_v62, %v2886_v4  ;;  %v1568_v35 = vld [vmem:[%s3309_s8 + $0x288] sm:$0xff]  ;;  %v1551_v46 = vld [vmem:[%s3309_s8 + $0x200] sm:$0xff]  ;;  %v1566_v20 = vld [vmem:[%s3309_s8 + $0x278] sm:$0xff] }
 0x336   :  { %v1475_v32 = vadd.f32 %v1448_v33, %v1437_v37  ;;  %v2407_v33 = vpack.c.bf16 %v1550_v26, %v1549_v24  ;;  %v1426_v24 = vrot.slane %v3074_v27, %v1425_v22  ;;  %v1430_v26 = vrot.slane %v3074_v27, %v1429_v23 }
 0x337   :  { %v1476_v31 = vadd.f32 %v1452_v18, %v1438_v39  ;;  %v1478_v42 = vadd.f32 %v1460_v36, %v1440_v40  ;;  %v1534_v18 = vld [vmem:[%s3309_s8 + $0x178] sm:$0xff]  ;;  %v1567_v36 = vld [vmem:[%s3309_s8 + $0x280] sm:$0xff]  ;;  %v1477_v37 = vadd.f32 %v1456_v30, %v1439_v29  ;;  %v1552_v39 = vld [vmem:[%s3309_s8 + $0x208] sm:$0xff]  ;;  %v1468_v30 = vrot.slane %v3076_v62, %v1429_v23 }
 0x338   :  { %v1481_v45 = vmax.f32 %v1475_v32, 0.0  ;;  %v2409_v4 = vpack.c.bf16 %v1534_v18, %v1533_v34  ;;  %v2411_v38 = vpack.c.bf16 %v1568_v35, %v1567_v36  ;;  %v1569_v40 = vld [vmem:[%s3309_s8 + $0x290] sm:$0xff]  ;;  %v1570_v32 = vld [vmem:[%s3309_s8 + $0x298] sm:$0xff]  ;;  %v2413_v41 = vpack.c.bf16 %v1552_v39, %v1551_v46  ;;  %v1829_v39 = vld [vmem:[#allocation16] ss:$0 sm:$0xff] }
 0x339   :  { %v1482_v43 = vmax.f32 %v1476_v31, 0.0  ;;  %v1484_v50 = vmax.f32 %v1478_v42, 0.0  ;;  %v1483_v3 = vmax.f32 %v1477_v37, 0.0  ;;  %v2415_v31 = vpack.c.bf16 %v1570_v32, %v1569_v40  ;;  %v1553_v42 = vld [vmem:[%s3309_s8 + $0x210] sm:$0xff] }
 0x33b   :  { %1654 = vmatprep.mubr.f32.mxu1 %v1482_v43  ;;  %v1572_v43 = vld [vmem:[%s3309_s8 + $0x2a8] sm:$0xff] }
 0x33c   :  { %1655 = vmatmul.mubr.f32.vlgmr.msra.gmra.mrb[10].mxu1 %v1481_v45  ;;  %v2419_v45 = vpack.c.bf16 %v1572_v43, %v1571_v13 }
 0x33d   :  { %2382 = vmatpush3.bf16.msra.mxu1 %v2381_v44  ;;  %1724 = vmatprep.mubr.f32.mxu1 %v1484_v50  ;;  %v2417_v44 = vpack.c.bf16 %v1554_v2, %v1553_v42  ;;  %v1574_v50 = vld [vmem:[%s3309_s8 + $0x2b8] sm:$0xff] }
 0x33e   :  { %2384 = vmatprep.subr.bf16.mxu1 %v2383_v47  ;;  %v1555_v47 = vld [vmem:[%s3309_s8 + $0x220] sm:$0xff]  ;;  %v2423_v52 = vpack.c.bf16 %v1574_v50, %v1573_v49 }
 0x33f   :  { %v2421_v51 = vpack.c.bf16 %v1556_v48, %v1555_v47 }
 0x341   :  { %2386 = vmatpush3.bf16.msra.mxu1 %v2385_v54  ;;  %v1557_v54 = vld [vmem:[%s3309_s8 + $0x230] sm:$0xff] }
 0x342   :  { %2388 = vmatprep.subr.bf16.mxu1 %v2387_v55  ;;  %v1558_v55 = vld [vmem:[%s3309_s8 + $0x238] sm:$0xff] }
 0x343   :  { %v2425_v57 = vpack.c.bf16 %v1558_v55, %v1557_v54 }
 0x345   :  { %2390 = vmatpush3.bf16.msra.mxu1 %v2389_v58  ;;  %v1559_v58 = vld [vmem:[%s3309_s8 + $0x240] sm:$0xff] }
 0x346   :  { %2392 = vmatprep.subr.bf16.mxu1 %v2391_v59  ;;  %v1560_v59 = vld [vmem:[%s3309_s8 + $0x248] sm:$0xff] }
 0x347   :  { %v2429_v63 = vpack.c.bf16 %v1560_v59, %v1559_v58 }
 0x349   :  { %2394 = vmatpush3.bf16.msra.mxu1 %v2393_v6  ;;  %v1561_v6 = vld [vmem:[%s3309_s8 + $0x250] sm:$0xff] }
 0x34a   :  { %2396 = vmatprep.subr.bf16.mxu1 %v2395_v7  ;;  %v1562_v7 = vld [vmem:[%s3309_s8 + $0x258] sm:$0xff] }
 0x34b   :  { %v2433_v10 = vpack.c.bf16 %v1562_v7, %v1561_v6 }
 0x34d   :  { %2398 = vmatpush3.bf16.msra.mxu1 %v2397_v0  ;;  %v1563_v0 = vld [vmem:[%s3309_s8 + $0x260] sm:$0xff] }
 0x34e   :  { %2400 = vmatprep.subr.bf16.mxu1 %v2399_v12  ;;  %v1564_v12 = vld [vmem:[%s3309_s8 + $0x268] sm:$0xff] }
 0x34f   :  { %v2437_v16 = vpack.c.bf16 %v1564_v12, %v1563_v0 }
 0x351   :  { %2402 = vmatpush3.bf16.msra.mxu1 %v2401_v19  ;;  %v1565_v19 = vld [vmem:[%s3309_s8 + $0x270] sm:$0xff]  ;;  %s2712_s8 = smov [#allocation17]  }
 0x352   :  { %2404 = vmatprep.subr.bf16.mxu1 %v2403_v21  ;;  %v2441_v21 = vpack.c.bf16 %v1566_v20, %v1565_v19  ;;  %s1808_s0 = sshll.u32 %s2712_s8, 4  ;;  %s1809_s0 = int_to_ptr.vmem [resolvable:$true] %s1808_s0 }
 0x353   :  { %s2663_s12 = scalar_lea.vmem %s1809_s0, 32  ;;  %p2668_p3 = scmp.lt.s32.totalorder %s1809_s0, %s1809_s0 }
 0x354   :  { %p2664_p2 = scmp.ne.s32.totalorder %s1809_s0, %s2663_s12  ;;  %p2669_p4 = scmp.lt.s32.totalorder %s2663_s12, %s2663_s12 }
 0x355   :  { %2406 = vmatpush3.bf16.msra.mxu1 %v2405_v28  ;;  %v1464_v28 = vrot.slane %v3076_v62, %v1425_v22 }
 0x356   :  { %2408 = vmatprep.subr.bf16.mxu1 %v2407_v33  ;;  %p2670_p5 = por %p2669_p4, %p2668_p3 }
 0x358   :  { %p2671_p6 = pnand %p2670_p5, %p2664_p2 }
 0x359   :  { %2410 = vmatpush3.bf16.msra.mxu1 %v2409_v4 }
 0x35a   :  { %2412 = vmatprep.subr.bf16.mxu1 %v2411_v38 }
 0x35c   :  { %1725 = vmatmul.mubr.f32.vlgmr.msra.gmra.mrb[12].mxu1 %v1483_v3 }
 0x35d   :  { %2414 = vmatpush3.bf16.msra.mxu1 %v2413_v41 }
 0x35e   :  { %2416 = vmatprep.subr.bf16.mxu1 %v2415_v31 }
 0x361   :  { %2418 = vmatpush3.bf16.msra.mxu1 %v2417_v44 }
 0x362   :  { %2420 = vmatprep.subr.bf16.mxu1 %v2419_v45 }
 0x365   :  { %2422 = vmatpush3.bf16.msra.mxu1 %v2421_v51 }
 0x366   :  { %2424 = vmatprep.subr.bf16.mxu1 %v2423_v52 }
 0x369   :  { %2426 = vmatpush3.bf16.msra.mxu1 %v2425_v57 }
 0x36a   :  { %2428 = vmatprep.subr.bf16.mxu1 %v2427_v25 }
 0x36d   :  { %2430 = vmatpush3.bf16.msra.mxu1 %v2429_v63 }
 0x36e   :  { %2432 = vmatprep.subr.bf16.mxu1 %v2431_v5 }
 0x371   :  { %2434 = vmatpush3.bf16.msra.mxu1 %v2433_v10 }
 0x372   :  { %2436 = vmatprep.subr.bf16.mxu1 %v2435_v11 }
 0x375   :  { %2438 = vmatpush3.bf16.msra.mxu1 %v2437_v16 }
 0x376   :  { %2440 = vmatprep.subr.bf16.mxu1 %v2439_v17 }
 0x379   :  { %2442 = vmatpush3.bf16.msra.mxu1 %v2441_v21 }
 0x3b3   :  { %v1400_v29 = vpop.f32.mrb[2].mxu0 }
 0x3b4   :  { %v1441_v33 = vmul.f32 %v1426_v24, %v1400_v29  ;;  %v1402_v34 = vpop.f32.mrb[3].mxu0 }
 0x3b5   :  { %v1442_v18 = vmul.f32 %v1430_v26, %v1402_v34 }
 0x3b6   :  { %v1479_v36 = vadd.f32 %v1464_v28, %v1441_v33 }
 0x3b7   :  { %v1480_v35 = vadd.f32 %v1468_v30, %v1442_v18 }
 0x3b8   :  { %v1485_v37 = vmax.f32 %v1479_v36, 0.0 }
 0x3b9   :  { %v1486_v4 = vmax.f32 %v1480_v35, 0.0 }
 0x3bb   :  { %1794 = vmatprep.mubr.f32.mxu1 %v1486_v4 }
 0x3bc   :  { %1795 = vmatmul.mubr.f32.vlgmr.msra.gmra.mrb[14].mxu1 %v1485_v37 }
 0x40f   :  { %v1870_v38 = vpop.f32.mrb[10].mxu1 }
 0x410   :  { %v1871_v1 = vpop.f32.mrb[11].mxu1 }
 0x411   :  { %v1872_v46 = vadd.f32 %v1871_v1, %v1870_v38 }
 0x413   :  { %v1657_v32 = vadd.f32 %v1872_v46, %v1829_v39 }
 0x42f   :  { %v1905_v40 = vpop.f32.mrb[12].mxu1 }
 0x430   :  { %v1906_v27 = vpop.f32.mrb[13].mxu1 }
 0x431   :  { %v1907_v41 = vadd.f32 %v1906_v27, %v1905_v40 }
 0x433   :  { %v1727_v3 = vadd.f32 %v1907_v41, %v1657_v32 }
 0x48f   :  { %v1940_v31 = vpop.f32.mrb[14].mxu1 }
 0x490   :  { %v1941_v62 = vpop.f32.mrb[15].mxu1 }
 0x491   :  { %v1942_v42 = vadd.f32 %v1941_v62, %v1940_v31 }
 0x493   :  { %v1797_v2 = vadd.f32 %v1942_v42, %v1727_v3 }
 0x495   :  { %1801 = vst.msk [vmem:[#allocation17] sm:$0x3] %vm1800_vm5, %v1797_v2 }
 0x496   :  { %2674 = shalt.err (!%p2671_p6)
}
 0x497   :  { %s2675_s24 = scalar_lea.hbm %s3311_s10, 32 }
 0x498   :  { %p2676_p7 = scmp.ne.s32.totalorder %s3311_s10, %s2675_s24  ;;  %p2679_p8 = scmp.lt.u32.totalorder %s2675_s24, %s3311_s10 }
 0x49a   :  { %p2681_p9 = pnand %p2679_p8, %p2676_p7 }
 0x49c   :  { %2684 = shalt.err (!%p2681_p9)
}
 0x49d   :  { %1811 = dma.vmem_to_hbm [thread:$0]  %s1809_s0, 32, %s3311_s10, [#allocation4]  }
 0x49e   :  { %2695 = dma.done.wait [#allocation4], 32  }
 0x49f   :  { %2696 = vsyncadd [#allocation4], 4294967264 }
 0x4a0   :  { %1815 = vsyncpa [#allocation3], 1 }
 0x4a1   :  { %1816 = vsyncpa [#allocation6], 1 }
 0x4a2   :  { %1817 = vsyncpa [#allocation9], 1 }
 0x4a3   :  { %1818 = vsyncpa [#allocation12], 1 }
 0x4a4   :  { %1819 = vsyncpa [#allocation15], 1 }
 0x4a5   :  { %1820 = vsyncpa [#allocation4], 1 }

</bundles_post_ra>
